<compile_context>
chip_gen: v7x
topology: tpu7x:2x2x1
jax: 0.10.0
libtpu: 0.0.40
codegen_flags: <defaults>
</compile_context>

<pallas_src>
import jax
import jax.numpy as jnp
from jax import lax
from jax.experimental import pallas as pl
from jax.experimental.pallas import tpu as pltpu

# ---------------- configuration (small, consistent with the module) --------------
B, C, RES, PATCH = 2, 3, 16, 4          # batch, in-channels, input_resolution, patch_size
WIDTH, LAYERS, HEADS = 32, 2, 4         # d_model, transformer layers, heads
L = (RES // PATCH) ** 2                 # patches per image = 16
LB = L * B                              # flattened token count = 32 (token-major row = l*B + b)
HD = WIDTH // HEADS                     # head dim = 8
K = C * PATCH * PATCH                   # flattened patch size = 48
HIDDEN = 4 * WIDTH                      # MLP hidden = 128
SLB = HEADS * LB                        # stacked (head, token) rows = 128
EPS = 1e-5                              # nn.LayerNorm default eps

# vec-slab row layout (all (1, WIDTH) parameters packed into one array)
_G_ROWS = 4                             # ln_pre_g, ln_pre_b, ln_post_g, ln_post_b
_NV = 9                                 # per layer: ln1_g, ln1_b, bq, bk, bv, bo, ln2_g, ln2_b, b2


# ---------------- in-kernel helpers ------------------------------------------------
def _layernorm(x, g, b):
    mu = jnp.mean(x, axis=-1, keepdims=True)
    xc = x - mu
    var = jnp.mean(xc * xc, axis=-1, keepdims=True)
    return xc * lax.rsqrt(var + EPS) * g + b


# ---------------- the single fused kernel ------------------------------------------
def vit_kernel(p_ref, wp_ref, pos_ref, hm_ref, bm_ref, vec_ref, b1_ref,
               wattn_ref, w1_ref, w2_ref, o_ref):
    """Whole ViT forward on a (LB, D) token-major activation slab kept in VMEM.

    p_ref     : (LB, K)        bf16   im2col'd patches
    wp_ref    : (K, D)         bf16   patch-embedding weight
    pos_ref   : (LB, D)        f32    positional embedding (token-major rows)
    hm_ref    : (SLB, D)       f32    head column mask, stacked by head
    bm_ref    : (SLB, LB)      f32    additive cross-batch mask, stacked by head
    vec_ref   : (N_vec, 1, D)  f32    all LN gains/biases + proj biases
    b1_ref    : (LAYERS, 1, 4D)f32    MLP c_fc bias
    wattn_ref : (LAYERS,4,D,D) bf16   wq | wk | wv | wo   (wq pre-scaled by 1/sqrt(HD))
    w1_ref    : (LAYERS, D,4D) bf16   MLP c_fc weight
    w2_ref    : (LAYERS,4D, D) bf16   MLP c_proj weight
    o_ref     : (LB, D)        f32    output
    """
    # ---- patch embedding: one (LB, K) @ (K, D) matmul for the whole batch ---------
    x = jnp.dot(p_ref[...], wp_ref[...], preferred_element_type=jnp.float32)
    x = x + pos_ref[...]                                    # positional embedding
    x = _layernorm(x, vec_ref[0], vec_ref[1])               # ln_pre

    hm = hm_ref[...]                                        # (SLB, D) 0/1 head mask
    bmask = bm_ref[...]                                     # (SLB, LB) additive batch mask

    for l in range(LAYERS):                                 # static unroll over layers
        base = _G_ROWS + l * _NV
        ln1_g = vec_ref[base + 0]
        ln1_b = vec_ref[base + 1]
        bq    = vec_ref[base + 2]                           # already scaled by 1/sqrt(HD)
        bk    = vec_ref[base + 3]
        bv    = vec_ref[base + 4]
        bo    = vec_ref[base + 5]
        ln2_g = vec_ref[base + 6]
        ln2_b = vec_ref[base + 7]
        b2    = vec_ref[base + 8]

        # -------- residual attention:  x + W_o(MHA(ln_1(x))) ------------------------
        xn = _layernorm(x, ln1_g, ln1_b)
        xnb = xn.astype(jnp.bfloat16)
        q = jnp.dot(xnb, wattn_ref[l, 0], preferred_element_type=jnp.float32) + bq
        k = jnp.dot(xnb, wattn_ref[l, 1], preferred_element_type=jnp.float32) + bk
        v = jnp.dot(xnb, wattn_ref[l, 2], preferred_element_type=jnp.float32) + bv

        # head-stacked scores: row h*LB+i of q_stack = q[i] masked to head h's columns,
        # so one matmul produces all heads' scores and ONE softmax handles all heads.
        q_stack = jnp.concatenate([q] * HEADS, axis=0) * hm                  # (SLB, D)
        s = lax.dot_general(q_stack.astype(jnp.bfloat16), k.astype(jnp.bfloat16),
                            (((1,), (1,)), ((), ())),
                            preferred_element_type=jnp.float32)              # (SLB, LB)
        s = s + bmask                                       # forbid cross-batch attention
        s = s - jnp.max(s, axis=-1, keepdims=True)
        p = jnp.exp(s)                                      # f32 transcendental (EUP)
        p = p * pl.reciprocal(jnp.sum(p, axis=-1, keepdims=True), approx=True)

        # one PV matmul for all heads; head mask + sublane-block sum = implicit concat
        av = jnp.dot(p.astype(jnp.bfloat16), v.astype(jnp.bfloat16),
                     preferred_element_type=jnp.float32) * hm                # (SLB, D)
        attn_out = av[0:LB]
        for h in range(1, HEADS):
            attn_out = attn_out + av[h * LB:(h + 1) * LB]                    # (LB, D)

        x = x + jnp.dot(attn_out.astype(jnp.bfloat16), wattn_ref[l, 3],
                        preferred_element_type=jnp.float32) + bo
        # TODO(synk): `Adaptor` is not defined in the reference source; treated as identity.

        # -------- residual MLP:  x + c_proj(QuickGELU(c_fc(ln_2(x)))) ----------------
        xn = _layernorm(x, ln2_g, ln2_b)
        h1 = jnp.dot(xn.astype(jnp.bfloat16), w1_ref[l],
                     preferred_element_type=jnp.float32) + b1_ref[l]         # (LB, 4D)
        h1 = h1 * jax.nn.sigmoid(1.702 * h1)                # QuickGELU (f32)
        x = x + jnp.dot(h1.astype(jnp.bfloat16), w2_ref[l],
                        preferred_element_type=jnp.float32) + b2

    o_ref[...] = _layernorm(x, vec_ref[2], vec_ref[3])      # ln_post


# ---------------- parameters (deterministic synthetic init, slab-packed) ----------
def init_params(key):
    ks = iter(jax.random.split(key, 64))
    nrm = lambda shape, s=0.02: (s * jax.random.normal(next(ks), shape)).astype(jnp.float32)
    ones = lambda shape: jnp.ones(shape, jnp.float32)
    zeros = lambda shape: jnp.zeros(shape, jnp.float32)
    q_scale = 1.0 / (HD ** 0.5)

    # positional embedding = (width**-0.5)*randn(L, width); repeated to token-major rows
    pos = (WIDTH ** -0.5) * jax.random.normal(next(ks), (L, WIDTH)).astype(jnp.float32)
    pos_rep = jnp.repeat(pos, B, axis=0)                     # row l*B + b -> pos[l]

    # additive cross-batch mask (token-major), stacked HEADS times along rows
    r = jnp.arange(LB)
    batch_mask = jnp.where((r[:, None] % B) == (r[None, :] % B),
                           0.0, -1e30).astype(jnp.float32)   # (LB, LB)
    bmask_stack = jnp.tile(batch_mask, (HEADS, 1))            # (SLB, LB)

    # head column mask, stacked: row h*LB+i selects head h's HD channels
    col = jnp.arange(WIDTH)
    head_mask = (col[None, :] // HD == jnp.arange(HEADS)[:, None]).astype(jnp.float32)
    hm_stack = jnp.repeat(head_mask, LB, axis=0)              # (SLB, WIDTH)

    vec_rows = [ones((1, WIDTH)), zeros((1, WIDTH)),          # ln_pre  g, b
                ones((1, WIDTH)), zeros((1, WIDTH))]          # ln_post g, b
    b1_rows, wattn, w1s, w2s = [], [], [], []
    for _ in range(LAYERS):
        wq = nrm((WIDTH, WIDTH)) * q_scale                    # 1/sqrt(HD) folded into wq AND bq
        bq = nrm((1, WIDTH)) * q_scale
        wk, bk = nrm((WIDTH, WIDTH)), nrm((1, WIDTH))
        wv, bv = nrm((WIDTH, WIDTH)), nrm((1, WIDTH))
        wo, bo = nrm((WIDTH, WIDTH)), nrm((1, WIDTH))
        w1, b1 = nrm((WIDTH, HIDDEN)), nrm((1, HIDDEN))
        w2, b2 = nrm((HIDDEN, WIDTH)), nrm((1, WIDTH))
        vec_rows += [ones((1, WIDTH)), zeros((1, WIDTH)),     # ln_1 g, b
                     bq, bk, bv, bo,
                     ones((1, WIDTH)), zeros((1, WIDTH)),     # ln_2 g, b
                     b2]
        b1_rows.append(b1)
        wattn.append(jnp.stack([wq, wk, wv, wo], axis=0))     # (4, D, D)
        w1s.append(w1)
        w2s.append(w2)

    return {
        'w_patch': nrm((K, WIDTH)).astype(jnp.bfloat16),                     # (K, D)
        'pos_rep': pos_rep,                                                   # (LB, D)
        'hm_stack': hm_stack,                                                 # (SLB, D)
        'bmask_stack': bmask_stack,                                           # (SLB, LB)
        'vec': jnp.stack(vec_rows, axis=0),                                   # (N_vec, 1, D) f32
        'b1': jnp.stack(b1_rows, axis=0),                                     # (LAYERS, 1, 4D) f32
        'w_attn': jnp.stack(wattn, axis=0).astype(jnp.bfloat16),              # (LAYERS, 4, D, D)
        'w1': jnp.stack(w1s, axis=0).astype(jnp.bfloat16),                    # (LAYERS, D, 4D)
        'w2': jnp.stack(w2s, axis=0).astype(jnp.bfloat16),                    # (LAYERS, 4D, D)
    }


# ---------------- full forward pass -------------------------------------------------
def vit_forward(x_rgb, params):
    """x_rgb: (B, C, H, W) NCHW float32.  Returns (L, B, D) as in the PyTorch module."""
    Bn, Cn, H, W = x_rgb.shape
    gh, gw = H // PATCH, W // PATCH

    # im2col for the non-overlapping patch conv, directly in token-major (l*B + b)
    # row order; channel order (c, ph, pw) matches the flattened conv weight.
    p = x_rgb.reshape(Bn, Cn, gh, PATCH, gw, PATCH)
    p = p.transpose(2, 4, 0, 1, 3, 5).reshape(gh * gw * Bn, Cn * PATCH * PATCH)
    p = p.astype(jnp.bfloat16)

    flat_inputs = [p, params['w_patch'], params['pos_rep'],
                   params['hm_stack'], params['bmask_stack'],
                   params['vec'], params['b1'],
                   params['w_attn'], params['w1'], params['w2']]

    vmem = pltpu.MemorySpace.VMEM
    out2d = pl.pallas_call(
        vit_kernel,
        out_shape=jax.ShapeDtypeStruct((LB, WIDTH), jnp.float32),
        in_specs=[pl.BlockSpec(memory_space=vmem)] * len(flat_inputs),
        out_specs=pl.BlockSpec(memory_space=vmem),
    )(*flat_inputs)

    # rows are already token-major (l*B + b): this reshape is pure metadata.
    return out2d.reshape(L, Bn, WIDTH)


# ---------------- main ----------------------------------------------------------------
if __name__ == "__main__":
    key = jax.random.PRNGKey(0)
    k_x, k_p = jax.random.split(key)
    x_rgb = jax.random.normal(k_x, (B, C, RES, RES), dtype=jnp.float32)
    params = init_params(k_p)

    fwd = jax.jit(vit_forward)
    out = fwd(x_rgb, params)
    out = jax.block_until_ready(out)
    assert out.shape == (L, B, WIDTH), out.shape
    assert bool(jnp.all(jnp.isfinite(out)))
    print("KERNEL_OK")
</pallas_src>

<mosaic_0001>
module attributes {stable_mosaic.version = 11 : i64} {
  func.func @vit_kernel(%arg0: memref<32x48xbf16, #tpu.memory_space<vmem>>, %arg1: memref<48x32xbf16, #tpu.memory_space<vmem>>, %arg2: memref<32x32xf32, #tpu.memory_space<vmem>>, %arg3: memref<128x32xf32, #tpu.memory_space<vmem>>, %arg4: memref<128x32xf32, #tpu.memory_space<vmem>>, %arg5: memref<22x1x32xf32, #tpu.memory_space<vmem>>, %arg6: memref<2x1x128xf32, #tpu.memory_space<vmem>>, %arg7: memref<2x4x32x32xbf16, #tpu.memory_space<vmem>>, %arg8: memref<2x32x128xbf16, #tpu.memory_space<vmem>>, %arg9: memref<2x128x32xbf16, #tpu.memory_space<vmem>>, %arg10: memref<32x32xf32, #tpu.memory_space<vmem>>) attributes {dimension_semantics = [], scalar_prefetch = 0 : i64, scratch_operands = 0 : i64, tpu.core_type = #tpu.core_type<tc>} {
    %c0 = arith.constant 0 : index
    %c0_0 = arith.constant 0 : index
    %0 = vector.load %arg0[%c0, %c0_0] : memref<32x48xbf16, #tpu.memory_space<vmem>>, vector<32x48xbf16>
    %c0_1 = arith.constant 0 : index
    %c0_2 = arith.constant 0 : index
    %1 = vector.load %arg1[%c0_1, %c0_2] : memref<48x32xbf16, #tpu.memory_space<vmem>>, vector<48x32xbf16>
    %cst = arith.constant dense<0.000000e+00> : vector<32x32xf32>
    %2 = tpu.matmul %0, %1, %cst {dimension_numbers = #tpu.dot_dimension_numbers<[1], [0], [0], [1], [0, 0, 1, 1], [], []>} : vector<32x48xbf16>, vector<48x32xbf16>, vector<32x32xf32> -> vector<32x32xf32>
    %c0_3 = arith.constant 0 : index
    %c0_4 = arith.constant 0 : index
    %3 = vector.load %arg2[%c0_3, %c0_4] : memref<32x32xf32, #tpu.memory_space<vmem>>, vector<32x32xf32>
    %4 = arith.addf %2, %3 : vector<32x32xf32>
    %c0_5 = arith.constant 0 : index
    %c0_6 = arith.constant 0 : index
    %c0_7 = arith.constant 0 : index
    %5 = vector.load %arg5[%c0_5, %c0_6, %c0_7] : memref<22x1x32xf32, #tpu.memory_space<vmem>>, vector<1x1x32xf32>
    %6 = vector.shape_cast %5 : vector<1x1x32xf32> to vector<1x32xf32>
    %c1 = arith.constant 1 : index
    %c0_8 = arith.constant 0 : index
    %c0_9 = arith.constant 0 : index
    %7 = vector.load %arg5[%c1, %c0_8, %c0_9] : memref<22x1x32xf32, #tpu.memory_space<vmem>>, vector<1x1x32xf32>
    %8 = vector.shape_cast %7 : vector<1x1x32xf32> to vector<1x32xf32>
    %cst_10 = arith.constant dense<0.000000e+00> : vector<32xf32>
    %9 = vector.multi_reduction <add>, %4, %cst_10 [1] : vector<32x32xf32> to vector<32xf32>
    %10 = vector.shape_cast %9 : vector<32xf32> to vector<32x1xf32>
    %cst_11 = arith.constant 3.200000e+01 : f32
    %11 = vector.broadcast %cst_11 : f32 to vector<32x1xf32>
    %12 = arith.divf %10, %11 : vector<32x1xf32>
    %13 = vector.broadcast %12 : vector<32x1xf32> to vector<32x32xf32>
    %14 = arith.subf %4, %13 : vector<32x32xf32>
    %15 = arith.mulf %14, %14 : vector<32x32xf32>
    %cst_12 = arith.constant dense<0.000000e+00> : vector<32xf32>
    %16 = vector.multi_reduction <add>, %15, %cst_12 [1] : vector<32x32xf32> to vector<32xf32>
    %17 = vector.shape_cast %16 : vector<32xf32> to vector<32x1xf32>
    %cst_13 = arith.constant 3.200000e+01 : f32
    %18 = vector.broadcast %cst_13 : f32 to vector<32x1xf32>
    %19 = arith.divf %17, %18 : vector<32x1xf32>
    %cst_14 = arith.constant 9.99999974E-6 : f32
    %20 = vector.broadcast %cst_14 : f32 to vector<32x1xf32>
    %21 = arith.addf %19, %20 : vector<32x1xf32>
    %22 = math.rsqrt %21 : vector<32x1xf32>
    %23 = vector.broadcast %22 : vector<32x1xf32> to vector<32x32xf32>
    %24 = arith.mulf %14, %23 : vector<32x32xf32>
    %25 = vector.broadcast %6 : vector<1x32xf32> to vector<32x32xf32>
    %26 = arith.mulf %24, %25 : vector<32x32xf32>
    %27 = vector.broadcast %8 : vector<1x32xf32> to vector<32x32xf32>
    %28 = arith.addf %26, %27 : vector<32x32xf32>
    %c0_15 = arith.constant 0 : index
    %c0_16 = arith.constant 0 : index
    %29 = vector.load %arg3[%c0_15, %c0_16] : memref<128x32xf32, #tpu.memory_space<vmem>>, vector<128x32xf32>
    %c0_17 = arith.constant 0 : index
    %c0_18 = arith.constant 0 : index
    %30 = vector.load %arg4[%c0_17, %c0_18] : memref<128x32xf32, #tpu.memory_space<vmem>>, vector<128x32xf32>
    %c4 = arith.constant 4 : index
    %c0_19 = arith.constant 0 : index
    %c0_20 = arith.constant 0 : index
    %31 = vector.load %arg5[%c4, %c0_19, %c0_20] : memref<22x1x32xf32, #tpu.memory_space<vmem>>, vector<1x1x32xf32>
    %32 = vector.shape_cast %31 : vector<1x1x32xf32> to vector<1x32xf32>
    %c5 = arith.constant 5 : index
    %c0_21 = arith.constant 0 : index
    %c0_22 = arith.constant 0 : index
    %33 = vector.load %arg5[%c5, %c0_21, %c0_22] : memref<22x1x32xf32, #tpu.memory_space<vmem>>, vector<1x1x32xf32>
    %34 = vector.shape_cast %33 : vector<1x1x32xf32> to vector<1x32xf32>
    %c6 = arith.constant 6 : index
    %c0_23 = arith.constant 0 : index
    %c0_24 = arith.constant 0 : index
    %35 = vector.load %arg5[%c6, %c0_23, %c0_24] : memref<22x1x32xf32, #tpu.memory_space<vmem>>, vector<1x1x32xf32>
    %36 = vector.shape_cast %35 : vector<1x1x32xf32> to vector<1x32xf32>
    %c7 = arith.constant 7 : index
    %c0_25 = arith.constant 0 : index
    %c0_26 = arith.constant 0 : index
    %37 = vector.load %arg5[%c7, %c0_25, %c0_26] : memref<22x1x32xf32, #tpu.memory_space<vmem>>, vector<1x1x32xf32>
    %38 = vector.shape_cast %37 : vector<1x1x32xf32> to vector<1x32xf32>
    %c8 = arith.constant 8 : index
    %c0_27 = arith.constant 0 : index
    %c0_28 = arith.constant 0 : index
    %39 = vector.load %arg5[%c8, %c0_27, %c0_28] : memref<22x1x32xf32, #tpu.memory_space<vmem>>, vector<1x1x32xf32>
    %40 = vector.shape_cast %39 : vector<1x1x32xf32> to vector<1x32xf32>
    %c9 = arith.constant 9 : index
    %c0_29 = arith.constant 0 : index
    %c0_30 = arith.constant 0 : index
    %41 = vector.load %arg5[%c9, %c0_29, %c0_30] : memref<22x1x32xf32, #tpu.memory_space<vmem>>, vector<1x1x32xf32>
    %42 = vector.shape_cast %41 : vector<1x1x32xf32> to vector<1x32xf32>
    %c10 = arith.constant 10 : index
    %c0_31 = arith.constant 0 : index
    %c0_32 = arith.constant 0 : index
    %43 = vector.load %arg5[%c10, %c0_31, %c0_32] : memref<22x1x32xf32, #tpu.memory_space<vmem>>, vector<1x1x32xf32>
    %44 = vector.shape_cast %43 : vector<1x1x32xf32> to vector<1x32xf32>
    %c11 = arith.constant 11 : index
    %c0_33 = arith.constant 0 : index
    %c0_34 = arith.constant 0 : index
    %45 = vector.load %arg5[%c11, %c0_33, %c0_34] : memref<22x1x32xf32, #tpu.memory_space<vmem>>, vector<1x1x32xf32>
    %46 = vector.shape_cast %45 : vector<1x1x32xf32> to vector<1x32xf32>
    %c12 = arith.constant 12 : index
    %c0_35 = arith.constant 0 : index
    %c0_36 = arith.constant 0 : index
    %47 = vector.load %arg5[%c12, %c0_35, %c0_36] : memref<22x1x32xf32, #tpu.memory_space<vmem>>, vector<1x1x32xf32>
    %48 = vector.shape_cast %47 : vector<1x1x32xf32> to vector<1x32xf32>
    %cst_37 = arith.constant dense<0.000000e+00> : vector<32xf32>
    %49 = vector.multi_reduction <add>, %28, %cst_37 [1] : vector<32x32xf32> to vector<32xf32>
    %50 = vector.shape_cast %49 : vector<32xf32> to vector<32x1xf32>
    %cst_38 = arith.constant 3.200000e+01 : f32
    %51 = vector.broadcast %cst_38 : f32 to vector<32x1xf32>
    %52 = arith.divf %50, %51 : vector<32x1xf32>
    %53 = vector.broadcast %52 : vector<32x1xf32> to vector<32x32xf32>
    %54 = arith.subf %28, %53 : vector<32x32xf32>
    %55 = arith.mulf %54, %54 : vector<32x32xf32>
    %cst_39 = arith.constant dense<0.000000e+00> : vector<32xf32>
    %56 = vector.multi_reduction <add>, %55, %cst_39 [1] : vector<32x32xf32> to vector<32xf32>
    %57 = vector.shape_cast %56 : vector<32xf32> to vector<32x1xf32>
    %cst_40 = arith.constant 3.200000e+01 : f32
    %58 = vector.broadcast %cst_40 : f32 to vector<32x1xf32>
    %59 = arith.divf %57, %58 : vector<32x1xf32>
    %cst_41 = arith.constant 9.99999974E-6 : f32
    %60 = vector.broadcast %cst_41 : f32 to vector<32x1xf32>
    %61 = arith.addf %59, %60 : vector<32x1xf32>
    %62 = math.rsqrt %61 : vector<32x1xf32>
    %63 = vector.broadcast %62 : vector<32x1xf32> to vector<32x32xf32>
    %64 = arith.mulf %54, %63 : vector<32x32xf32>
    %65 = vector.broadcast %32 : vector<1x32xf32> to vector<32x32xf32>
    %66 = arith.mulf %64, %65 : vector<32x32xf32>
    %67 = vector.broadcast %34 : vector<1x32xf32> to vector<32x32xf32>
    %68 = arith.addf %66, %67 : vector<32x32xf32>
    %69 = arith.truncf %68 : vector<32x32xf32> to vector<32x32xbf16>
    %c0_42 = arith.constant 0 : index
    %c0_43 = arith.constant 0 : index
    %c0_44 = arith.constant 0 : index
    %c0_45 = arith.constant 0 : index
    %70 = vector.load %arg7[%c0_42, %c0_43, %c0_44, %c0_45] : memref<2x4x32x32xbf16, #tpu.memory_space<vmem>>, vector<1x1x32x32xbf16>
    %71 = vector.shape_cast %70 : vector<1x1x32x32xbf16> to vector<32x32xbf16>
    %cst_46 = arith.constant dense<0.000000e+00> : vector<32x32xf32>
    %72 = tpu.matmul %69, %71, %cst_46 {dimension_numbers = #tpu.dot_dimension_numbers<[1], [0], [0], [1], [0, 0, 1, 1], [], []>} : vector<32x32xbf16>, vector<32x32xbf16>, vector<32x32xf32> -> vector<32x32xf32>
    %73 = vector.broadcast %36 : vector<1x32xf32> to vector<32x32xf32>
    %74 = arith.addf %72, %73 : vector<32x32xf32>
    %c0_47 = arith.constant 0 : index
    %c1_48 = arith.constant 1 : index
    %c0_49 = arith.constant 0 : index
    %c0_50 = arith.constant 0 : index
    %75 = vector.load %arg7[%c0_47, %c1_48, %c0_49, %c0_50] : memref<2x4x32x32xbf16, #tpu.memory_space<vmem>>, vector<1x1x32x32xbf16>
    %76 = vector.shape_cast %75 : vector<1x1x32x32xbf16> to vector<32x32xbf16>
    %cst_51 = arith.constant dense<0.000000e+00> : vector<32x32xf32>
    %77 = tpu.matmul %69, %76, %cst_51 {dimension_numbers = #tpu.dot_dimension_numbers<[1], [0], [0], [1], [0, 0, 1, 1], [], []>} : vector<32x32xbf16>, vector<32x32xbf16>, vector<32x32xf32> -> vector<32x32xf32>
    %78 = vector.broadcast %38 : vector<1x32xf32> to vector<32x32xf32>
    %79 = arith.addf %77, %78 : vector<32x32xf32>
    %c0_52 = arith.constant 0 : index
    %c2 = arith.constant 2 : index
    %c0_53 = arith.constant 0 : index
    %c0_54 = arith.constant 0 : index
    %80 = vector.load %arg7[%c0_52, %c2, %c0_53, %c0_54] : memref<2x4x32x32xbf16, #tpu.memory_space<vmem>>, vector<1x1x32x32xbf16>
    %81 = vector.shape_cast %80 : vector<1x1x32x32xbf16> to vector<32x32xbf16>
    %cst_55 = arith.constant dense<0.000000e+00> : vector<32x32xf32>
    %82 = tpu.matmul %69, %81, %cst_55 {dimension_numbers = #tpu.dot_dimension_numbers<[1], [0], [0], [1], [0, 0, 1, 1], [], []>} : vector<32x32xbf16>, vector<32x32xbf16>, vector<32x32xf32> -> vector<32x32xf32>
    %83 = vector.broadcast %40 : vector<1x32xf32> to vector<32x32xf32>
    %84 = arith.addf %82, %83 : vector<32x32xf32>
    %85 = tpu.concatenate %74, %74, %74, %74 in 0 : vector<32x32xf32>, vector<32x32xf32>, vector<32x32xf32>, vector<32x32xf32> -> vector<128x32xf32>
    %86 = arith.mulf %85, %29 : vector<128x32xf32>
    %87 = arith.truncf %86 : vector<128x32xf32> to vector<128x32xbf16>
    %88 = arith.truncf %79 : vector<32x32xf32> to vector<32x32xbf16>
    %cst_56 = arith.constant dense<0.000000e+00> : vector<128x32xf32>
    %89 = tpu.matmul %87, %88, %cst_56 {dimension_numbers = #tpu.dot_dimension_numbers<[1], [1], [0], [0], [0, 0, 1, 0], [], []>} : vector<128x32xbf16>, vector<32x32xbf16>, vector<128x32xf32> -> vector<128x32xf32>
    %90 = arith.addf %89, %30 : vector<128x32xf32>
    %cst_57 = arith.constant dense<0xFF800000> : vector<128xf32>
    %91 = vector.multi_reduction <maximumf>, %90, %cst_57 [1] : vector<128x32xf32> to vector<128xf32>
    %92 = vector.shape_cast %91 : vector<128xf32> to vector<128x1xf32>
    %93 = vector.broadcast %92 : vector<128x1xf32> to vector<128x32xf32>
    %94 = arith.subf %90, %93 : vector<128x32xf32>
    %95 = math.exp %94 : vector<128x32xf32>
    %cst_58 = arith.constant dense<0.000000e+00> : vector<128xf32>
    %96 = vector.multi_reduction <add>, %95, %cst_58 [1] : vector<128x32xf32> to vector<128xf32>
    %97 = vector.shape_cast %96 : vector<128xf32> to vector<128x1xf32>
    %98 = tpu.reciprocal %97 {approx = true} : vector<128x1xf32> -> vector<128x1xf32>
    %99 = vector.broadcast %98 : vector<128x1xf32> to vector<128x32xf32>
    %100 = arith.mulf %95, %99 : vector<128x32xf32>
    %101 = arith.truncf %100 : vector<128x32xf32> to vector<128x32xbf16>
    %102 = arith.truncf %84 : vector<32x32xf32> to vector<32x32xbf16>
    %cst_59 = arith.constant dense<0.000000e+00> : vector<128x32xf32>
    %103 = tpu.matmul %101, %102, %cst_59 {dimension_numbers = #tpu.dot_dimension_numbers<[1], [0], [0], [1], [0, 0, 1, 1], [], []>} : vector<128x32xbf16>, vector<32x32xbf16>, vector<128x32xf32> -> vector<128x32xf32>
    %104 = arith.mulf %103, %29 : vector<128x32xf32>
    %105 = vector.extract_strided_slice %104 {offsets = [0, 0], sizes = [32, 32], strides = [1, 1]} : vector<128x32xf32> to vector<32x32xf32>
    %106 = vector.extract_strided_slice %104 {offsets = [32, 0], sizes = [32, 32], strides = [1, 1]} : vector<128x32xf32> to vector<32x32xf32>
    %107 = arith.addf %105, %106 : vector<32x32xf32>
    %108 = vector.extract_strided_slice %104 {offsets = [64, 0], sizes = [32, 32], strides = [1, 1]} : vector<128x32xf32> to vector<32x32xf32>
    %109 = arith.addf %107, %108 : vector<32x32xf32>
    %110 = vector.extract_strided_slice %104 {offsets = [96, 0], sizes = [32, 32], strides = [1, 1]} : vector<128x32xf32> to vector<32x32xf32>
    %111 = arith.addf %109, %110 : vector<32x32xf32>
    %112 = arith.truncf %111 : vector<32x32xf32> to vector<32x32xbf16>
    %c0_60 = arith.constant 0 : index
    %c3 = arith.constant 3 : index
    %c0_61 = arith.constant 0 : index
    %c0_62 = arith.constant 0 : index
    %113 = vector.load %arg7[%c0_60, %c3, %c0_61, %c0_62] : memref<2x4x32x32xbf16, #tpu.memory_space<vmem>>, vector<1x1x32x32xbf16>
    %114 = vector.shape_cast %113 : vector<1x1x32x32xbf16> to vector<32x32xbf16>
    %cst_63 = arith.constant dense<0.000000e+00> : vector<32x32xf32>
    %115 = tpu.matmul %112, %114, %cst_63 {dimension_numbers = #tpu.dot_dimension_numbers<[1], [0], [0], [1], [0, 0, 1, 1], [], []>} : vector<32x32xbf16>, vector<32x32xbf16>, vector<32x32xf32> -> vector<32x32xf32>
    %116 = arith.addf %28, %115 : vector<32x32xf32>
    %117 = vector.broadcast %42 : vector<1x32xf32> to vector<32x32xf32>
    %118 = arith.addf %116, %117 : vector<32x32xf32>
    %cst_64 = arith.constant dense<0.000000e+00> : vector<32xf32>
    %119 = vector.multi_reduction <add>, %118, %cst_64 [1] : vector<32x32xf32> to vector<32xf32>
    %120 = vector.shape_cast %119 : vector<32xf32> to vector<32x1xf32>
    %cst_65 = arith.constant 3.200000e+01 : f32
    %121 = vector.broadcast %cst_65 : f32 to vector<32x1xf32>
    %122 = arith.divf %120, %121 : vector<32x1xf32>
    %123 = vector.broadcast %122 : vector<32x1xf32> to vector<32x32xf32>
    %124 = arith.subf %118, %123 : vector<32x32xf32>
    %125 = arith.mulf %124, %124 : vector<32x32xf32>
    %cst_66 = arith.constant dense<0.000000e+00> : vector<32xf32>
    %126 = vector.multi_reduction <add>, %125, %cst_66 [1] : vector<32x32xf32> to vector<32xf32>
    %127 = vector.shape_cast %126 : vector<32xf32> to vector<32x1xf32>
    %cst_67 = arith.constant 3.200000e+01 : f32
    %128 = vector.broadcast %cst_67 : f32 to vector<32x1xf32>
    %129 = arith.divf %127, %128 : vector<32x1xf32>
    %cst_68 = arith.constant 9.99999974E-6 : f32
    %130 = vector.broadcast %cst_68 : f32 to vector<32x1xf32>
    %131 = arith.addf %129, %130 : vector<32x1xf32>
    %132 = math.rsqrt %131 : vector<32x1xf32>
    %133 = vector.broadcast %132 : vector<32x1xf32> to vector<32x32xf32>
    %134 = arith.mulf %124, %133 : vector<32x32xf32>
    %135 = vector.broadcast %44 : vector<1x32xf32> to vector<32x32xf32>
    %136 = arith.mulf %134, %135 : vector<32x32xf32>
    %137 = vector.broadcast %46 : vector<1x32xf32> to vector<32x32xf32>
    %138 = arith.addf %136, %137 : vector<32x32xf32>
    %139 = arith.truncf %138 : vector<32x32xf32> to vector<32x32xbf16>
    %c0_69 = arith.constant 0 : index
    %c0_70 = arith.constant 0 : index
    %c0_71 = arith.constant 0 : index
    %140 = vector.load %arg8[%c0_69, %c0_70, %c0_71] : memref<2x32x128xbf16, #tpu.memory_space<vmem>>, vector<1x32x128xbf16>
    %141 = vector.shape_cast %140 : vector<1x32x128xbf16> to vector<32x128xbf16>
    %cst_72 = arith.constant dense<0.000000e+00> : vector<32x128xf32>
    %142 = tpu.matmul %139, %141, %cst_72 {dimension_numbers = #tpu.dot_dimension_numbers<[1], [0], [0], [1], [0, 0, 1, 1], [], []>} : vector<32x32xbf16>, vector<32x128xbf16>, vector<32x128xf32> -> vector<32x128xf32>
    %c0_73 = arith.constant 0 : index
    %c0_74 = arith.constant 0 : index
    %c0_75 = arith.constant 0 : index
    %143 = vector.load %arg6[%c0_73, %c0_74, %c0_75] : memref<2x1x128xf32, #tpu.memory_space<vmem>>, vector<1x1x128xf32>
    %144 = vector.shape_cast %143 : vector<1x1x128xf32> to vector<1x128xf32>
    %145 = vector.broadcast %144 : vector<1x128xf32> to vector<32x128xf32>
    %146 = arith.addf %142, %145 : vector<32x128xf32>
    %cst_76 = arith.constant 1.702000e+00 : f32
    %147 = vector.broadcast %cst_76 : f32 to vector<32x128xf32>
    %148 = arith.mulf %147, %146 : vector<32x128xf32>
    %149 = arith.negf %148 : vector<32x128xf32>
    %150 = math.exp %149 : vector<32x128xf32>
    %cst_77 = arith.constant 1.000000e+00 : f32
    %151 = vector.broadcast %cst_77 : f32 to vector<32x128xf32>
    %152 = arith.addf %151, %150 : vector<32x128xf32>
    %153 = arith.divf %151, %152 : vector<32x128xf32>
    %154 = arith.mulf %146, %153 : vector<32x128xf32>
    %155 = arith.truncf %154 : vector<32x128xf32> to vector<32x128xbf16>
    %c0_78 = arith.constant 0 : index
    %c0_79 = arith.constant 0 : index
    %c0_80 = arith.constant 0 : index
    %156 = vector.load %arg9[%c0_78, %c0_79, %c0_80] : memref<2x128x32xbf16, #tpu.memory_space<vmem>>, vector<1x128x32xbf16>
    %157 = vector.shape_cast %156 : vector<1x128x32xbf16> to vector<128x32xbf16>
    %cst_81 = arith.constant dense<0.000000e+00> : vector<32x32xf32>
    %158 = tpu.matmul %155, %157, %cst_81 {dimension_numbers = #tpu.dot_dimension_numbers<[1], [0], [0], [1], [0, 0, 1, 1], [], []>} : vector<32x128xbf16>, vector<128x32xbf16>, vector<32x32xf32> -> vector<32x32xf32>
    %159 = arith.addf %118, %158 : vector<32x32xf32>
    %160 = vector.broadcast %48 : vector<1x32xf32> to vector<32x32xf32>
    %161 = arith.addf %159, %160 : vector<32x32xf32>
    %c13 = arith.constant 13 : index
    %c0_82 = arith.constant 0 : index
    %c0_83 = arith.constant 0 : index
    %162 = vector.load %arg5[%c13, %c0_82, %c0_83] : memref<22x1x32xf32, #tpu.memory_space<vmem>>, vector<1x1x32xf32>
    %163 = vector.shape_cast %162 : vector<1x1x32xf32> to vector<1x32xf32>
    %c14 = arith.constant 14 : index
    %c0_84 = arith.constant 0 : index
    %c0_85 = arith.constant 0 : index
    %164 = vector.load %arg5[%c14, %c0_84, %c0_85] : memref<22x1x32xf32, #tpu.memory_space<vmem>>, vector<1x1x32xf32>
    %165 = vector.shape_cast %164 : vector<1x1x32xf32> to vector<1x32xf32>
    %c15 = arith.constant 15 : index
    %c0_86 = arith.constant 0 : index
    %c0_87 = arith.constant 0 : index
    %166 = vector.load %arg5[%c15, %c0_86, %c0_87] : memref<22x1x32xf32, #tpu.memory_space<vmem>>, vector<1x1x32xf32>
    %167 = vector.shape_cast %166 : vector<1x1x32xf32> to vector<1x32xf32>
    %c16 = arith.constant 16 : index
    %c0_88 = arith.constant 0 : index
    %c0_89 = arith.constant 0 : index
    %168 = vector.load %arg5[%c16, %c0_88, %c0_89] : memref<22x1x32xf32, #tpu.memory_space<vmem>>, vector<1x1x32xf32>
    %169 = vector.shape_cast %168 : vector<1x1x32xf32> to vector<1x32xf32>
    %c17 = arith.constant 17 : index
    %c0_90 = arith.constant 0 : index
    %c0_91 = arith.constant 0 : index
    %170 = vector.load %arg5[%c17, %c0_90, %c0_91] : memref<22x1x32xf32, #tpu.memory_space<vmem>>, vector<1x1x32xf32>
    %171 = vector.shape_cast %170 : vector<1x1x32xf32> to vector<1x32xf32>
    %c18 = arith.constant 18 : index
    %c0_92 = arith.constant 0 : index
    %c0_93 = arith.constant 0 : index
    %172 = vector.load %arg5[%c18, %c0_92, %c0_93] : memref<22x1x32xf32, #tpu.memory_space<vmem>>, vector<1x1x32xf32>
    %173 = vector.shape_cast %172 : vector<1x1x32xf32> to vector<1x32xf32>
    %c19 = arith.constant 19 : index
    %c0_94 = arith.constant 0 : index
    %c0_95 = arith.constant 0 : index
    %174 = vector.load %arg5[%c19, %c0_94, %c0_95] : memref<22x1x32xf32, #tpu.memory_space<vmem>>, vector<1x1x32xf32>
    %175 = vector.shape_cast %174 : vector<1x1x32xf32> to vector<1x32xf32>
    %c20 = arith.constant 20 : index
    %c0_96 = arith.constant 0 : index
    %c0_97 = arith.constant 0 : index
    %176 = vector.load %arg5[%c20, %c0_96, %c0_97] : memref<22x1x32xf32, #tpu.memory_space<vmem>>, vector<1x1x32xf32>
    %177 = vector.shape_cast %176 : vector<1x1x32xf32> to vector<1x32xf32>
    %c21 = arith.constant 21 : index
    %c0_98 = arith.constant 0 : index
    %c0_99 = arith.constant 0 : index
    %178 = vector.load %arg5[%c21, %c0_98, %c0_99] : memref<22x1x32xf32, #tpu.memory_space<vmem>>, vector<1x1x32xf32>
    %179 = vector.shape_cast %178 : vector<1x1x32xf32> to vector<1x32xf32>
    %cst_100 = arith.constant dense<0.000000e+00> : vector<32xf32>
    %180 = vector.multi_reduction <add>, %161, %cst_100 [1] : vector<32x32xf32> to vector<32xf32>
    %181 = vector.shape_cast %180 : vector<32xf32> to vector<32x1xf32>
    %cst_101 = arith.constant 3.200000e+01 : f32
    %182 = vector.broadcast %cst_101 : f32 to vector<32x1xf32>
    %183 = arith.divf %181, %182 : vector<32x1xf32>
    %184 = vector.broadcast %183 : vector<32x1xf32> to vector<32x32xf32>
    %185 = arith.subf %161, %184 : vector<32x32xf32>
    %186 = arith.mulf %185, %185 : vector<32x32xf32>
    %cst_102 = arith.constant dense<0.000000e+00> : vector<32xf32>
    %187 = vector.multi_reduction <add>, %186, %cst_102 [1] : vector<32x32xf32> to vector<32xf32>
    %188 = vector.shape_cast %187 : vector<32xf32> to vector<32x1xf32>
    %cst_103 = arith.constant 3.200000e+01 : f32
    %189 = vector.broadcast %cst_103 : f32 to vector<32x1xf32>
    %190 = arith.divf %188, %189 : vector<32x1xf32>
    %cst_104 = arith.constant 9.99999974E-6 : f32
    %191 = vector.broadcast %cst_104 : f32 to vector<32x1xf32>
    %192 = arith.addf %190, %191 : vector<32x1xf32>
    %193 = math.rsqrt %192 : vector<32x1xf32>
    %194 = vector.broadcast %193 : vector<32x1xf32> to vector<32x32xf32>
    %195 = arith.mulf %185, %194 : vector<32x32xf32>
    %196 = vector.broadcast %163 : vector<1x32xf32> to vector<32x32xf32>
    %197 = arith.mulf %195, %196 : vector<32x32xf32>
    %198 = vector.broadcast %165 : vector<1x32xf32> to vector<32x32xf32>
    %199 = arith.addf %197, %198 : vector<32x32xf32>
    %200 = arith.truncf %199 : vector<32x32xf32> to vector<32x32xbf16>
    %c1_105 = arith.constant 1 : index
    %c0_106 = arith.constant 0 : index
    %c0_107 = arith.constant 0 : index
    %c0_108 = arith.constant 0 : index
    %201 = vector.load %arg7[%c1_105, %c0_106, %c0_107, %c0_108] : memref<2x4x32x32xbf16, #tpu.memory_space<vmem>>, vector<1x1x32x32xbf16>
    %202 = vector.shape_cast %201 : vector<1x1x32x32xbf16> to vector<32x32xbf16>
    %cst_109 = arith.constant dense<0.000000e+00> : vector<32x32xf32>
    %203 = tpu.matmul %200, %202, %cst_109 {dimension_numbers = #tpu.dot_dimension_numbers<[1], [0], [0], [1], [0, 0, 1, 1], [], []>} : vector<32x32xbf16>, vector<32x32xbf16>, vector<32x32xf32> -> vector<32x32xf32>
    %204 = vector.broadcast %167 : vector<1x32xf32> to vector<32x32xf32>
    %205 = arith.addf %203, %204 : vector<32x32xf32>
    %c1_110 = arith.constant 1 : index
    %c1_111 = arith.constant 1 : index
    %c0_112 = arith.constant 0 : index
    %c0_113 = arith.constant 0 : index
    %206 = vector.load %arg7[%c1_110, %c1_111, %c0_112, %c0_113] : memref<2x4x32x32xbf16, #tpu.memory_space<vmem>>, vector<1x1x32x32xbf16>
    %207 = vector.shape_cast %206 : vector<1x1x32x32xbf16> to vector<32x32xbf16>
    %cst_114 = arith.constant dense<0.000000e+00> : vector<32x32xf32>
    %208 = tpu.matmul %200, %207, %cst_114 {dimension_numbers = #tpu.dot_dimension_numbers<[1], [0], [0], [1], [0, 0, 1, 1], [], []>} : vector<32x32xbf16>, vector<32x32xbf16>, vector<32x32xf32> -> vector<32x32xf32>
    %209 = vector.broadcast %169 : vector<1x32xf32> to vector<32x32xf32>
    %210 = arith.addf %208, %209 : vector<32x32xf32>
    %c1_115 = arith.constant 1 : index
    %c2_116 = arith.constant 2 : index
    %c0_117 = arith.constant 0 : index
    %c0_118 = arith.constant 0 : index
    %211 = vector.load %arg7[%c1_115, %c2_116, %c0_117, %c0_118] : memref<2x4x32x32xbf16, #tpu.memory_space<vmem>>, vector<1x1x32x32xbf16>
    %212 = vector.shape_cast %211 : vector<1x1x32x32xbf16> to vector<32x32xbf16>
    %cst_119 = arith.constant dense<0.000000e+00> : vector<32x32xf32>
    %213 = tpu.matmul %200, %212, %cst_119 {dimension_numbers = #tpu.dot_dimension_numbers<[1], [0], [0], [1], [0, 0, 1, 1], [], []>} : vector<32x32xbf16>, vector<32x32xbf16>, vector<32x32xf32> -> vector<32x32xf32>
    %214 = vector.broadcast %171 : vector<1x32xf32> to vector<32x32xf32>
    %215 = arith.addf %213, %214 : vector<32x32xf32>
    %216 = tpu.concatenate %205, %205, %205, %205 in 0 : vector<32x32xf32>, vector<32x32xf32>, vector<32x32xf32>, vector<32x32xf32> -> vector<128x32xf32>
    %217 = arith.mulf %216, %29 : vector<128x32xf32>
    %218 = arith.truncf %217 : vector<128x32xf32> to vector<128x32xbf16>
    %219 = arith.truncf %210 : vector<32x32xf32> to vector<32x32xbf16>
    %cst_120 = arith.constant dense<0.000000e+00> : vector<128x32xf32>
    %220 = tpu.matmul %218, %219, %cst_120 {dimension_numbers = #tpu.dot_dimension_numbers<[1], [1], [0], [0], [0, 0, 1, 0], [], []>} : vector<128x32xbf16>, vector<32x32xbf16>, vector<128x32xf32> -> vector<128x32xf32>
    %221 = arith.addf %220, %30 : vector<128x32xf32>
    %cst_121 = arith.constant dense<0xFF800000> : vector<128xf32>
    %222 = vector.multi_reduction <maximumf>, %221, %cst_121 [1] : vector<128x32xf32> to vector<128xf32>
    %223 = vector.shape_cast %222 : vector<128xf32> to vector<128x1xf32>
    %224 = vector.broadcast %223 : vector<128x1xf32> to vector<128x32xf32>
    %225 = arith.subf %221, %224 : vector<128x32xf32>
    %226 = math.exp %225 : vector<128x32xf32>
    %cst_122 = arith.constant dense<0.000000e+00> : vector<128xf32>
    %227 = vector.multi_reduction <add>, %226, %cst_122 [1] : vector<128x32xf32> to vector<128xf32>
    %228 = vector.shape_cast %227 : vector<128xf32> to vector<128x1xf32>
    %229 = tpu.reciprocal %228 {approx = true} : vector<128x1xf32> -> vector<128x1xf32>
    %230 = vector.broadcast %229 : vector<128x1xf32> to vector<128x32xf32>
    %231 = arith.mulf %226, %230 : vector<128x32xf32>
    %232 = arith.truncf %231 : vector<128x32xf32> to vector<128x32xbf16>
    %233 = arith.truncf %215 : vector<32x32xf32> to vector<32x32xbf16>
    %cst_123 = arith.constant dense<0.000000e+00> : vector<128x32xf32>
    %234 = tpu.matmul %232, %233, %cst_123 {dimension_numbers = #tpu.dot_dimension_numbers<[1], [0], [0], [1], [0, 0, 1, 1], [], []>} : vector<128x32xbf16>, vector<32x32xbf16>, vector<128x32xf32> -> vector<128x32xf32>
    %235 = arith.mulf %234, %29 : vector<128x32xf32>
    %236 = vector.extract_strided_slice %235 {offsets = [0, 0], sizes = [32, 32], strides = [1, 1]} : vector<128x32xf32> to vector<32x32xf32>
    %237 = vector.extract_strided_slice %235 {offsets = [32, 0], sizes = [32, 32], strides = [1, 1]} : vector<128x32xf32> to vector<32x32xf32>
    %238 = arith.addf %236, %237 : vector<32x32xf32>
    %239 = vector.extract_strided_slice %235 {offsets = [64, 0], sizes = [32, 32], strides = [1, 1]} : vector<128x32xf32> to vector<32x32xf32>
    %240 = arith.addf %238, %239 : vector<32x32xf32>
    %241 = vector.extract_strided_slice %235 {offsets = [96, 0], sizes = [32, 32], strides = [1, 1]} : vector<128x32xf32> to vector<32x32xf32>
    %242 = arith.addf %240, %241 : vector<32x32xf32>
    %243 = arith.truncf %242 : vector<32x32xf32> to vector<32x32xbf16>
    %c1_124 = arith.constant 1 : index
    %c3_125 = arith.constant 3 : index
    %c0_126 = arith.constant 0 : index
    %c0_127 = arith.constant 0 : index
    %244 = vector.load %arg7[%c1_124, %c3_125, %c0_126, %c0_127] : memref<2x4x32x32xbf16, #tpu.memory_space<vmem>>, vector<1x1x32x32xbf16>
    %245 = vector.shape_cast %244 : vector<1x1x32x32xbf16> to vector<32x32xbf16>
    %cst_128 = arith.constant dense<0.000000e+00> : vector<32x32xf32>
    %246 = tpu.matmul %243, %245, %cst_128 {dimension_numbers = #tpu.dot_dimension_numbers<[1], [0], [0], [1], [0, 0, 1, 1], [], []>} : vector<32x32xbf16>, vector<32x32xbf16>, vector<32x32xf32> -> vector<32x32xf32>
    %247 = arith.addf %161, %246 : vector<32x32xf32>
    %248 = vector.broadcast %173 : vector<1x32xf32> to vector<32x32xf32>
    %249 = arith.addf %247, %248 : vector<32x32xf32>
    %cst_129 = arith.constant dense<0.000000e+00> : vector<32xf32>
    %250 = vector.multi_reduction <add>, %249, %cst_129 [1] : vector<32x32xf32> to vector<32xf32>
    %251 = vector.shape_cast %250 : vector<32xf32> to vector<32x1xf32>
    %cst_130 = arith.constant 3.200000e+01 : f32
    %252 = vector.broadcast %cst_130 : f32 to vector<32x1xf32>
    %253 = arith.divf %251, %252 : vector<32x1xf32>
    %254 = vector.broadcast %253 : vector<32x1xf32> to vector<32x32xf32>
    %255 = arith.subf %249, %254 : vector<32x32xf32>
    %256 = arith.mulf %255, %255 : vector<32x32xf32>
    %cst_131 = arith.constant dense<0.000000e+00> : vector<32xf32>
    %257 = vector.multi_reduction <add>, %256, %cst_131 [1] : vector<32x32xf32> to vector<32xf32>
    %258 = vector.shape_cast %257 : vector<32xf32> to vector<32x1xf32>
    %cst_132 = arith.constant 3.200000e+01 : f32
    %259 = vector.broadcast %cst_132 : f32 to vector<32x1xf32>
    %260 = arith.divf %258, %259 : vector<32x1xf32>
    %cst_133 = arith.constant 9.99999974E-6 : f32
    %261 = vector.broadcast %cst_133 : f32 to vector<32x1xf32>
    %262 = arith.addf %260, %261 : vector<32x1xf32>
    %263 = math.rsqrt %262 : vector<32x1xf32>
    %264 = vector.broadcast %263 : vector<32x1xf32> to vector<32x32xf32>
    %265 = arith.mulf %255, %264 : vector<32x32xf32>
    %266 = vector.broadcast %175 : vector<1x32xf32> to vector<32x32xf32>
    %267 = arith.mulf %265, %266 : vector<32x32xf32>
    %268 = vector.broadcast %177 : vector<1x32xf32> to vector<32x32xf32>
    %269 = arith.addf %267, %268 : vector<32x32xf32>
    %270 = arith.truncf %269 : vector<32x32xf32> to vector<32x32xbf16>
    %c1_134 = arith.constant 1 : index
    %c0_135 = arith.constant 0 : index
    %c0_136 = arith.constant 0 : index
    %271 = vector.load %arg8[%c1_134, %c0_135, %c0_136] : memref<2x32x128xbf16, #tpu.memory_space<vmem>>, vector<1x32x128xbf16>
    %272 = vector.shape_cast %271 : vector<1x32x128xbf16> to vector<32x128xbf16>
    %cst_137 = arith.constant dense<0.000000e+00> : vector<32x128xf32>
    %273 = tpu.matmul %270, %272, %cst_137 {dimension_numbers = #tpu.dot_dimension_numbers<[1], [0], [0], [1], [0, 0, 1, 1], [], []>} : vector<32x32xbf16>, vector<32x128xbf16>, vector<32x128xf32> -> vector<32x128xf32>
    %c1_138 = arith.constant 1 : index
    %c0_139 = arith.constant 0 : index
    %c0_140 = arith.constant 0 : index
    %274 = vector.load %arg6[%c1_138, %c0_139, %c0_140] : memref<2x1x128xf32, #tpu.memory_space<vmem>>, vector<1x1x128xf32>
    %275 = vector.shape_cast %274 : vector<1x1x128xf32> to vector<1x128xf32>
    %276 = vector.broadcast %275 : vector<1x128xf32> to vector<32x128xf32>
    %277 = arith.addf %273, %276 : vector<32x128xf32>
    %cst_141 = arith.constant 1.702000e+00 : f32
    %278 = vector.broadcast %cst_141 : f32 to vector<32x128xf32>
    %279 = arith.mulf %278, %277 : vector<32x128xf32>
    %280 = arith.negf %279 : vector<32x128xf32>
    %281 = math.exp %280 : vector<32x128xf32>
    %cst_142 = arith.constant 1.000000e+00 : f32
    %282 = vector.broadcast %cst_142 : f32 to vector<32x128xf32>
    %283 = arith.addf %282, %281 : vector<32x128xf32>
    %284 = arith.divf %282, %283 : vector<32x128xf32>
    %285 = arith.mulf %277, %284 : vector<32x128xf32>
    %286 = arith.truncf %285 : vector<32x128xf32> to vector<32x128xbf16>
    %c1_143 = arith.constant 1 : index
    %c0_144 = arith.constant 0 : index
    %c0_145 = arith.constant 0 : index
    %287 = vector.load %arg9[%c1_143, %c0_144, %c0_145] : memref<2x128x32xbf16, #tpu.memory_space<vmem>>, vector<1x128x32xbf16>
    %288 = vector.shape_cast %287 : vector<1x128x32xbf16> to vector<128x32xbf16>
    %cst_146 = arith.constant dense<0.000000e+00> : vector<32x32xf32>
    %289 = tpu.matmul %286, %288, %cst_146 {dimension_numbers = #tpu.dot_dimension_numbers<[1], [0], [0], [1], [0, 0, 1, 1], [], []>} : vector<32x128xbf16>, vector<128x32xbf16>, vector<32x32xf32> -> vector<32x32xf32>
    %290 = arith.addf %249, %289 : vector<32x32xf32>
    %291 = vector.broadcast %179 : vector<1x32xf32> to vector<32x32xf32>
    %292 = arith.addf %290, %291 : vector<32x32xf32>
    %c2_147 = arith.constant 2 : index
    %c0_148 = arith.constant 0 : index
    %c0_149 = arith.constant 0 : index
    %293 = vector.load %arg5[%c2_147, %c0_148, %c0_149] : memref<22x1x32xf32, #tpu.memory_space<vmem>>, vector<1x1x32xf32>
    %294 = vector.shape_cast %293 : vector<1x1x32xf32> to vector<1x32xf32>
    %c3_150 = arith.constant 3 : index
    %c0_151 = arith.constant 0 : index
    %c0_152 = arith.constant 0 : index
    %295 = vector.load %arg5[%c3_150, %c0_151, %c0_152] : memref<22x1x32xf32, #tpu.memory_space<vmem>>, vector<1x1x32xf32>
    %296 = vector.shape_cast %295 : vector<1x1x32xf32> to vector<1x32xf32>
    %cst_153 = arith.constant dense<0.000000e+00> : vector<32xf32>
    %297 = vector.multi_reduction <add>, %292, %cst_153 [1] : vector<32x32xf32> to vector<32xf32>
    %298 = vector.shape_cast %297 : vector<32xf32> to vector<32x1xf32>
    %cst_154 = arith.constant 3.200000e+01 : f32
    %299 = vector.broadcast %cst_154 : f32 to vector<32x1xf32>
    %300 = arith.divf %298, %299 : vector<32x1xf32>
    %301 = vector.broadcast %300 : vector<32x1xf32> to vector<32x32xf32>
    %302 = arith.subf %292, %301 : vector<32x32xf32>
    %303 = arith.mulf %302, %302 : vector<32x32xf32>
    %cst_155 = arith.constant dense<0.000000e+00> : vector<32xf32>
    %304 = vector.multi_reduction <add>, %303, %cst_155 [1] : vector<32x32xf32> to vector<32xf32>
    %305 = vector.shape_cast %304 : vector<32xf32> to vector<32x1xf32>
    %cst_156 = arith.constant 3.200000e+01 : f32
    %306 = vector.broadcast %cst_156 : f32 to vector<32x1xf32>
    %307 = arith.divf %305, %306 : vector<32x1xf32>
    %cst_157 = arith.constant 9.99999974E-6 : f32
    %308 = vector.broadcast %cst_157 : f32 to vector<32x1xf32>
    %309 = arith.addf %307, %308 : vector<32x1xf32>
    %310 = math.rsqrt %309 : vector<32x1xf32>
    %311 = vector.broadcast %310 : vector<32x1xf32> to vector<32x32xf32>
    %312 = arith.mulf %302, %311 : vector<32x32xf32>
    %313 = vector.broadcast %294 : vector<1x32xf32> to vector<32x32xf32>
    %314 = arith.mulf %312, %313 : vector<32x32xf32>
    %315 = vector.broadcast %296 : vector<1x32xf32> to vector<32x32xf32>
    %316 = arith.addf %314, %315 : vector<32x32xf32>
    %c0_158 = arith.constant 0 : index
    %c0_159 = arith.constant 0 : index
    %317 = vector.load %arg10[%c0_158, %c0_159] : memref<32x32xf32, #tpu.memory_space<vmem>>, vector<32x32xf32>
    tpu.vector_store %arg10[%c0_158, %c0_159], %316 {strides = array<i32>} : memref<32x32xf32, #tpu.memory_space<vmem>>, vector<32x32xf32>,
    return
  }
}

</mosaic_0001>

<bundles_post_ra>
// kernel: vit_forward.1
= control target key start
LH: loop header
LB: loop body
LE: loop exit
PB: predicated region body
PF: predicated region fallthrough
CT: control target
= control target key end

     0   :  { %vm79_vm0 = vcmask 392192   ;;  %s4705_s0 = inlined_call_operand.vmem [shape: bf16[32,48], index: 0, kind: input, shape index: {}]   ;;  %s4706_s1 = inlined_call_operand.vmem [shape: bf16[48,32], index: 1, kind: input, shape index: {}]   ;;  %s4707_s2 = inlined_call_operand.vmem [shape: f32[32,32], index: 2, kind: input, shape index: {}]   ;;  %s4708_s3 = inlined_call_operand.vmem [shape: f32[128,32], index: 3, kind: input, shape index: {}]   ;;  %s4709_s4 = inlined_call_operand.vmem [shape: f32[128,32], index: 4, kind: input, shape index: {}]   ;;  %s4710_s5 = inlined_call_operand.vmem [shape: f32[22,1,32], index: 5, kind: input, shape index: {}]   ;;  %s4711_s6 = inlined_call_operand.vmem [shape: f32[2,1,128], index: 6, kind: input, shape index: {}]   ;;  %s4712_s7 = inlined_call_operand.vmem [shape: bf16[2,4,32,32], index: 7, kind: input, shape index: {}]   ;;  %s4713_s8 = inlined_call_operand.vmem [shape: bf16[2,32,128], index: 8, kind: input, shape index: {}]   ;;  %s4714_s9 = inlined_call_operand.vmem [shape: bf16[2,128,32], index: 9, kind: input, shape index: {}]   ;;  %s4715_s10 = inlined_call_operand.hbm [shape: f32[32,32], index: 10, kind: output, shape index: {}]  }
   0x1   :  { %v3267_v0 = vld [vmem:[%s4706_s1] sm:$0xff]   ;;  %v3268_v1 = vld [vmem:[%s4706_s1 + $0x8] sm:$0xff]   ;;  %v3269_v3 = vld [vmem:[%s4706_s1 + $0x10] sm:$0xff]  }
   0x2   :  { %3050 = vmatprep.subr.bf16.mxu0 %v3267_v0  ;;  %v3270_v2 = vld [vmem:[%s4705_s0] sm:$0xff]   ;;  %v3271_v4 = vld [vmem:[%s4705_s0 + $0x8] sm:$0xff]  }
   0x3   :  { %3051 = vmatpush3.bf16.msra.mxu0 %v3267_v0  ;;  %3056 = vmatprep.mubr.msk.bf16.mxu0 %vm79_vm0, %v3270_v2 }
   0x4   :  { %3052 = vmatprep.subr.bf16.mxu0 %v3268_v1 }
   0x7   :  { %3053 = vmatpush3.bf16.msra.mxu0 %v3268_v1 }
   0x8   :  { %3054 = vmatprep.subr.bf16.mxu0 %v3269_v3 }
   0xb   :  { %3055 = vmatpush3.bf16.msra.mxu0 %v3269_v3 }
   0xe   :  { %3057 = vmatmul.mubr.msk.bf16.vlgmr.msra.gmra.mrb[0].mxu0 %vm79_vm0, %v3271_v4 }
   0xf   :  { %15 = vsyncpa [#allocation3], 0  ;;  %v49_v5 = vld [vmem:[%s4707_s2 + $0x10] sm:$0xff]  ;;  %v47_v6 = vld [vmem:[%s4707_s2] sm:$0xff]  ;;  %vm138_vm1 = vcmask 261120   ;;  %s3572_s16 = smov [#allocation2]  }
  0x10   :  { %v50_v8 = vld [vmem:[%s4707_s2 + $0x18] sm:$0xff]  ;;  %v48_v11 = vld [vmem:[%s4707_s2 + $0x8] sm:$0xff]  ;;  %v2756_v54 = vld [vmem:[%s4710_s5] ss:$0 sm:$0xff] }
  0x11   :  { %v2757_v56 = vld [vmem:[%s4710_s5 + $0x1] ss:$0 sm:$0xff] }
  0xe1   :  { %v3058_v7 = vpop.f32.mrb[0].mxu0 }
  0xe2   :  { %v129_v9 = vadd.f32 %v3058_v7, %v49_v5  ;;  %v120_v10 = vpop.f32.mrb[1].mxu0 }
  0xe3   :  { %v121_v12 = vadd.f32 %v120_v10, %v47_v6  ;;  %v3059_v13 = vpop.f32.mrb[2].mxu0 }
  0xe4   :  { %v132_v14 = vadd.f32 %v3059_v13, %v50_v8  ;;  %v123_v15 = vpop.f32.mrb[3].mxu0  ;;  %v145_v16 = vsel %vm138_vm1, %v129_v9, 0.0 }
  0xe5   :  { %v124_v17 = vadd.f32 %v123_v15, %v48_v11  ;;  %146 = vadd.xlane.f32.xlu1 %v145_v16  ;;  %v139_v18 = vsel %vm138_vm1, %v121_v12, 0.0 }
  0xe6   :  { %140 = vadd.xlane.f32.xlu0 %v139_v18  ;;  %v148_v19 = vsel %vm138_vm1, %v132_v14, 0.0 }
  0xe7   :  { %v142_v20 = vsel %vm138_vm1, %v124_v17, 0.0 }
  0xe9   :  { %149 = vadd.xlane.f32.xlu1 %v148_v19 }
  0xea   :  { %143 = vadd.xlane.f32.xlu0 %v142_v20 }
 0x172   :  { %v147_v21 = vpop.xlane.xlu1 %146 }
 0x173   :  { %v154_v22 = vmul.f32 0.03125, %v147_v21  ;;  %v141_v23 = vpop.xlane.xlu0 %140 }
 0x174   :  { %v152_v24 = vmul.f32 0.03125, %v141_v23 }
 0x175   :  { %v158_v25 = vsub.f32 %v129_v9, %v154_v22 }
 0x176   :  { %v156_v26 = vsub.f32 %v121_v12, %v152_v24  ;;  %v150_v27 = vpop.xlane.xlu1 %149 }
 0x177   :  { %v155_v28 = vmul.f32 0.03125, %v150_v27  ;;  %v144_v29 = vpop.xlane.xlu0 %143  ;;  %v162_v35 = vmul.f32 %v158_v25, %v158_v25 }
 0x178   :  { %v153_v30 = vmul.f32 0.03125, %v144_v29  ;;  %v160_v31 = vmul.f32 %v156_v26, %v156_v26 }
 0x179   :  { %v159_v32 = vsub.f32 %v132_v14, %v155_v28  ;;  %v170_v37 = vsel %vm138_vm1, %v162_v35, 0.0  ;;  %v3276_v35 = vld [vmem:[%s4712_s7 + $0x20] sm:$0xff]  }
 0x17a   :  { %v157_v33 = vsub.f32 %v124_v17, %v153_v30  ;;  %v164_v34 = vsel %vm138_vm1, %v160_v31, 0.0  ;;  %v3272_v31 = vld [vmem:[%s4712_s7] sm:$0xff]  }
 0x17b   :  { %165 = vadd.xlane.f32.xlu0 %v164_v34  ;;  %v163_v39 = vmul.f32 %v159_v32, %v159_v32  ;;  %3060 = vmatprep.subr.bf16.mxu0 %v3272_v31  ;;  %v3275_v34 = vld [vmem:[%s4712_s7 + $0x18] sm:$0xff]  }
 0x17c   :  { %v161_v36 = vmul.f32 %v157_v33, %v157_v33  ;;  %3061 = vmatpush3.bf16.msra.mxu0 %v3272_v31 }
 0x17d   :  { %v173_v40 = vsel %vm138_vm1, %v163_v39, 0.0 }
 0x17e   :  { %v167_v38 = vsel %vm138_vm1, %v161_v36, 0.0 }
 0x17f   :  { %171 = vadd.xlane.f32.xlu0 %v170_v37  ;;  %168 = vadd.xlane.f32.xlu1 %v167_v38 }
 0x183   :  { %174 = vadd.xlane.f32.xlu1 %v173_v40 }
 0x208   :  { %v166_v41 = vpop.xlane.xlu0 %165 }
 0x209   :  { %v176_v42 = vmul.f32 0.03125, %v166_v41 }
 0x20b   :  { %v180_v43 = vadd.f32 1e-05, %v176_v42 }
 0x20c   :  { %v169_v44 = vpop.xlane.xlu1 %168  ;;  %v172_v45 = vpop.xlane.xlu0 %171 }
 0x20d   :  { %3308 = vrsqrt.f32 %v180_v43  ;;  %v177_v46 = vmul.f32 0.03125, %v169_v44  ;;  %v178_v47 = vmul.f32 0.03125, %v172_v45 }
 0x20f   :  { %v181_v48 = vadd.f32 1e-05, %v177_v46  ;;  %v182_v49 = vadd.f32 1e-05, %v178_v47 }
 0x210   :  { %v175_v50 = vpop.xlane.xlu1 %174 }
 0x211   :  { %3310 = vrsqrt.f32 %v181_v48  ;;  %v179_v51 = vmul.f32 0.03125, %v175_v50  ;;  %v2767_v50 = vld [vmem:[%s4710_s5 + $0x4] ss:$0 sm:$0xff] }
 0x212   :  { %3312 = vrsqrt.f32 %v182_v49 }
 0x213   :  { %v183_v52 = vadd.f32 1e-05, %v179_v51 }
 0x215   :  { %3314 = vrsqrt.f32 %v183_v52 }
 0x217   :  { %v3309_v53 = vpop.eup %3308 }
 0x218   :  { %v188_v55 = vmul.f32 %v3309_v53, %v156_v26 }
 0x21a   :  { %v198_v57 = vmul.f32 %v2756_v54, %v188_v55 }
 0x21b   :  { %v3311_v58 = vpop.eup %3310 }
 0x21c   :  { %v3313_v59 = vpop.eup %3312  ;;  %v3671_v60 = vadd.f32 %v2757_v56, %v198_v57  ;;  %v189_v61 = vmul.f32 %v3311_v58, %v157_v33  ;;  %v3274_v33 = vld [vmem:[%s4712_s7 + $0x8] sm:$0xff]  }
 0x21d   :  { %v190_v62 = vmul.f32 %v3313_v59, %v158_v25  ;;  %3062 = vmatprep.subr.bf16.mxu0 %v3274_v33 }
 0x21e   :  { %v262_v63 = vsel %vm138_vm1, %v3671_v60, 0.0  ;;  %v199_v0 = vmul.f32 %v2756_v54, %v189_v61  ;;  %3063 = vmatpush3.bf16.msra.mxu0 %v3274_v33 }
 0x21f   :  { %v3315_v1 = vpop.eup %3314  ;;  %263 = vadd.xlane.f32.xlu0 %v262_v63  ;;  %v200_v2 = vmul.f32 %v2756_v54, %v190_v62  ;;  %3076 = vmatprep.subr.bf16.mxu0 %v3276_v35 }
 0x220   :  { %v3675_v3 = vadd.f32 %v2757_v56, %v199_v0  ;;  %v191_v4 = vmul.f32 %v3315_v1, %v159_v32  ;;  %v3273_v32 = vld [vmem:[%s4712_s7 + $0x10] sm:$0xff]  }
 0x221   :  { %v3677_v5 = vadd.f32 %v2757_v56, %v200_v2  ;;  %3068 = vmatprep.subr.bf16.mxu1 %v3273_v32 }
 0x222   :  { %v265_v6 = vsel %vm138_vm1, %v3675_v3, 0.0  ;;  %v201_v7 = vmul.f32 %v2756_v54, %v191_v4  ;;  %3069 = vmatpush3.bf16.msra.mxu1 %v3273_v32 }
 0x223   :  { %266 = vadd.xlane.f32.xlu1 %v265_v6  ;;  %v268_v8 = vsel %vm138_vm1, %v3677_v5, 0.0  ;;  %3070 = vmatprep.subr.bf16.mxu1 %v3275_v34 }
 0x224   :  { %269 = vadd.xlane.f32.xlu0 %v268_v8  ;;  %v3683_v9 = vadd.f32 %v2757_v56, %v201_v7  ;;  %v2768_v56 = vld [vmem:[%s4710_s5 + $0x5] ss:$0 sm:$0xff]  ;;  %v3277_v7 = vld [vmem:[%s4712_s7 + $0x28] sm:$0xff]   ;;  %v2769_v8 = vld [vmem:[%s4710_s5 + $0x6] ss:$0 sm:$0xff] }
 0x226   :  { %v271_v10 = vsel %vm138_vm1, %v3683_v9, 0.0  ;;  %3071 = vmatpush3.bf16.msra.mxu1 %v3275_v34  ;;  %v3781_v34 = vld [vmem:[%s4708_s3 + $0x18] sm:$0xff] }
 0x227   :  { %272 = vadd.xlane.f32.xlu1 %v271_v10 }
 0x2ac   :  { %v264_v11 = vpop.xlane.xlu0 %263 }
 0x2ad   :  { %v274_v12 = vmul.f32 0.03125, %v264_v11 }
 0x2af   :  { %v278_v13 = vsub.f32 %v3671_v60, %v274_v12  ;;  %v2778_v12 = vld [vmem:[%s4710_s5 + $0x7] ss:$0 sm:$0xff] }
 0x2b0   :  { %v267_v14 = vpop.xlane.xlu1 %266 }
 0x2b1   :  { %v275_v15 = vmul.f32 0.03125, %v267_v14  ;;  %v270_v16 = vpop.xlane.xlu0 %269  ;;  %v282_v17 = vmul.f32 %v278_v13, %v278_v13  ;;  %v3739_v14 = vld [vmem:[%s4708_s3 + $0x30] sm:$0xff] }
 0x2b2   :  { %v276_v18 = vmul.f32 0.03125, %v270_v16 }
 0x2b3   :  { %v279_v19 = vsub.f32 %v3675_v3, %v275_v15  ;;  %v286_v20 = vsel %vm138_vm1, %v282_v17, 0.0  ;;  %v3744_v15 = vld [vmem:[%s4708_s3 + $0x50] sm:$0xff] }
 0x2b4   :  { %v280_v21 = vsub.f32 %v3677_v5, %v276_v18  ;;  %v273_v22 = vpop.xlane.xlu1 %272  ;;  %287 = vadd.xlane.f32.xlu0 %v286_v20  ;;  %v3754_v20 = vld [vmem:[%s4708_s3] sm:$0xff] }
 0x2b5   :  { %v277_v23 = vmul.f32 0.03125, %v273_v22  ;;  %v283_v24 = vmul.f32 %v279_v19, %v279_v19 }
 0x2b6   :  { %v284_v25 = vmul.f32 %v280_v21, %v280_v21 }
 0x2b7   :  { %v281_v26 = vsub.f32 %v3683_v9, %v277_v23  ;;  %v289_v27 = vsel %vm138_vm1, %v283_v24, 0.0 }
 0x2b8   :  { %290 = vadd.xlane.f32.xlu1 %v289_v27  ;;  %v292_v28 = vsel %vm138_vm1, %v284_v25, 0.0  ;;  %v3759_v25 = vld [vmem:[%s4708_s3 + $0x20] sm:$0xff] }
 0x2b9   :  { %293 = vadd.xlane.f32.xlu0 %v292_v28  ;;  %v285_v29 = vmul.f32 %v281_v26, %v281_v26  ;;  %v3769_v27 = vld [vmem:[%s4708_s3 + $0x60] sm:$0xff] }
 0x2bb   :  { %v295_v30 = vsel %vm138_vm1, %v285_v29, 0.0 }
 0x2bc   :  { %296 = vadd.xlane.f32.xlu1 %v295_v30 }
 0x341   :  { %v288_v36 = vpop.xlane.xlu0 %287 }
 0x342   :  { %v298_v37 = vmul.f32 0.03125, %v288_v36  ;;  %v3791_v36 = vld [vmem:[%s4708_s3 + $0x58] sm:$0xff] }
 0x344   :  { %v302_v38 = vadd.f32 1e-05, %v298_v37 }
 0x345   :  { %v291_v39 = vpop.xlane.xlu1 %290 }
 0x346   :  { %3316 = vrsqrt.f32 %v302_v38  ;;  %v299_v40 = vmul.f32 0.03125, %v291_v39  ;;  %v294_v41 = vpop.xlane.xlu0 %293  ;;  %v3796_v39 = vld [vmem:[%s4708_s3 + $0x8] sm:$0xff] }
 0x347   :  { %v300_v42 = vmul.f32 0.03125, %v294_v41  ;;  %v3806_v41 = vld [vmem:[%s4708_s3 + $0x48] sm:$0xff] }
 0x348   :  { %v303_v43 = vadd.f32 1e-05, %v299_v40  ;;  %v3801_v40 = vld [vmem:[%s4708_s3 + $0x28] sm:$0xff] }
 0x349   :  { %v304_v44 = vadd.f32 1e-05, %v300_v42  ;;  %v297_v45 = vpop.xlane.xlu1 %296 }
 0x34a   :  { %3318 = vrsqrt.f32 %v303_v43  ;;  %v301_v46 = vmul.f32 0.03125, %v297_v45 }
 0x34b   :  { %3320 = vrsqrt.f32 %v304_v44 }
 0x34c   :  { %v305_v47 = vadd.f32 1e-05, %v301_v46 }
 0x34e   :  { %3322 = vrsqrt.f32 %v305_v47 }
 0x350   :  { %v3317_v48 = vpop.eup %3316 }
 0x351   :  { %v310_v49 = vmul.f32 %v3317_v48, %v278_v13  ;;  %v3734_v13 = vld [vmem:[%s4708_s3 + $0x10] sm:$0xff]  ;;  %v3815_v48 = vld [vmem:[%s4708_s3 + $0x78] sm:$0xff] }
 0x353   :  { %v320_v54 = vmul.f32 %v2767_v50, %v310_v49  ;;  %v3820_v49 = vld [vmem:[%s4708_s3 + $0x68] sm:$0xff] }
 0x354   :  { %v3319_v51 = vpop.eup %3318 }
 0x355   :  { %v3321_v52 = vpop.eup %3320  ;;  %v311_v53 = vmul.f32 %v3319_v51, %v279_v19  ;;  %v330_v62 = vadd.f32 %v2768_v56, %v320_v54  ;;  %v3749_v19 = vld [vmem:[%s4708_s3 + $0x70] sm:$0xff]  ;;  %v2787_v54 = vld [vmem:[%s4710_s5 + $0x8] ss:$0 sm:$0xff] }
 0x356   :  { %v312_v55 = vmul.f32 %v3321_v52, %v280_v21 }
 0x357   :  { %v321_v57 = vmul.f32 %v2767_v50, %v311_v53 }
 0x358   :  { %v3323_v58 = vpop.eup %3322  ;;  %v322_v59 = vmul.f32 %v2767_v50, %v312_v55 }
 0x359   :  { %v313_v61 = vmul.f32 %v3323_v58, %v281_v26  ;;  %v331_v63 = vadd.f32 %v2768_v56, %v321_v57  ;;  %v3764_v26 = vld [vmem:[%s4708_s3 + $0x40] sm:$0xff] }
 0x35a   :  { %v332_v2 = vadd.f32 %v2768_v56, %v322_v59 }
 0x35b   :  { %v323_v0 = vmul.f32 %v2767_v50, %v313_v61  ;;  %v334_v1 = vpack.c.bf16 %v331_v63, %v330_v62 }
 0x35d   :  { %3064 = vmatprep.mubr.msk.bf16.mxu0 %vm138_vm1, %v334_v1  ;;  %3072 = vmatprep.mubr.msk.bf16.mxu1 %vm138_vm1, %v334_v1  ;;  %v333_v4 = vadd.f32 %v2768_v56, %v323_v0 }
 0x35f   :  { %v335_v6 = vpack.c.bf16 %v333_v4, %v332_v2 }
 0x361   :  { %3065 = vmatmul.mubr.msk.bf16.vlgmr.msra.gmra.mrb[4].mxu0 %vm138_vm1, %v335_v6  ;;  %3073 = vmatmul.mubr.msk.bf16.vlgmr.msra.gmra.mrb[0].mxu1 %vm138_vm1, %v335_v6 }
 0x362   :  { %3077 = vmatpush3.bf16.msra.mxu0 %v3276_v35  ;;  %3080 = vmatprep.mubr.msk.bf16.mxu0 %vm138_vm1, %v334_v1  ;;  %v3786_v35 = vld [vmem:[%s4708_s3 + $0x38] sm:$0xff] }
 0x363   :  { %3078 = vmatprep.subr.bf16.mxu0 %v3277_v7 }
 0x366   :  { %3079 = vmatpush3.bf16.msra.mxu0 %v3277_v7 }
 0x369   :  { %3081 = vmatmul.mubr.msk.bf16.vlgmr.msra.gmra.mrb[8].mxu0 %vm138_vm1, %v335_v6 }
 0x434   :  { %v3066_v10 = vpop.f32.mrb[4].mxu0  ;;  %v3074_v11 = vpop.f32.mrb[0].mxu1 }
 0x435   :  { %v407_v16 = vadd.f32 %v3066_v10, %v2769_v8  ;;  %v398_v17 = vpop.f32.mrb[5].mxu0  ;;  %v470_v18 = vpop.f32.mrb[1].mxu1  ;;  %v479_v24 = vadd.f32 %v3074_v11, %v2778_v12 }
 0x436   :  { %v399_v21 = vadd.f32 %v2769_v8, %v398_v17  ;;  %v3067_v22 = vpop.f32.mrb[6].mxu0  ;;  %v3075_v23 = vpop.f32.mrb[2].mxu1  ;;  %v471_v33 = vadd.f32 %v2778_v12, %v470_v18 }
 0x437   :  { %v401_v28 = vpop.f32.mrb[7].mxu0  ;;  %v473_v29 = vpop.f32.mrb[3].mxu1  ;;  %v559_v30 = vmul.f32 %v407_v16, %v3734_v13  ;;  %v3773_v31 = vmul.f32 %v407_v16, %v3739_v14  ;;  %v3776_v32 = vmul.f32 %v407_v16, %v3744_v15  ;;  %v410_v37 = vadd.f32 %v3067_v22, %v2769_v8 }
 0x438   :  { %v482_v38 = vadd.f32 %v3075_v23, %v2778_v12  ;;  %v402_v42 = vadd.f32 %v2769_v8, %v401_v28  ;;  %v474_v43 = vadd.f32 %v2778_v12, %v473_v29  ;;  %v571_v44 = vmul.f32 %v407_v16, %v3749_v19 }
 0x439   :  { %v557_v45 = vmul.f32 %v399_v21, %v3754_v20  ;;  %v561_v46 = vmul.f32 %v399_v21, %v3759_v25  ;;  %v565_v47 = vmul.f32 %v399_v21, %v3764_v26  ;;  %v569_v50 = vmul.f32 %v399_v21, %v3769_v27 }
 0x43a   :  { %v560_v51 = vmul.f32 %v410_v37, %v3781_v34  ;;  %v564_v52 = vmul.f32 %v410_v37, %v3786_v35  ;;  %v568_v53 = vmul.f32 %v410_v37, %v3791_v36  ;;  %v582_v55 = vpack.c.bf16 %v482_v38, %v479_v24 }
 0x43b   :  { %v558_v56 = vmul.f32 %v402_v42, %v3796_v39  ;;  %v562_v57 = vmul.f32 %v402_v42, %v3801_v40  ;;  %v566_v58 = vmul.f32 %v402_v42, %v3806_v41  ;;  %v572_v61 = vmul.f32 %v410_v37, %v3815_v48  ;;  %v229_v37 = vld [vmem:[%s4709_s4 + $0x8] sm:$0xff] }
 0x43c   :  { %v3082_v59 = vpop.f32.mrb[8].mxu0  ;;  %v574_v62 = vpack.c.bf16 %v560_v51, %v559_v30  ;;  %v570_v63 = vmul.f32 %v402_v42, %v3820_v49  ;;  %v581_v0 = vpack.c.bf16 %v474_v43, %v471_v33  ;;  %v576_v16 = vpack.c.bf16 %v564_v52, %v3773_v31  ;;  %v228_v30 = vld [vmem:[%s4709_s4] sm:$0xff]  ;;  %v231_v43 = vld [vmem:[%s4709_s4 + $0x18] sm:$0xff] }
 0x43d   :  { %v542_v1 = vpop.f32.mrb[9].mxu0  ;;  %v551_v2 = vadd.f32 %v3082_v59, %v2787_v54  ;;  %v573_v7 = vpack.c.bf16 %v558_v56, %v557_v45  ;;  %v575_v8 = vpack.c.bf16 %v562_v57, %v561_v46  ;;  %v577_v17 = vpack.c.bf16 %v566_v58, %v565_v47  ;;  %v232_v52 = vld [vmem:[%s4709_s4 + $0x20] sm:$0xff]  ;;  %v233_v57 = vld [vmem:[%s4709_s4 + $0x28] sm:$0xff] }
 0x43e   :  { %v543_v4 = vadd.f32 %v2787_v54, %v542_v1  ;;  %v3083_v6 = vpop.f32.mrb[10].mxu0  ;;  %3260 = vmatprep.subr.msk.bf16.mxu1 %vm138_vm1, %v581_v0  ;;  %v608_v10 = vsel %vm138_vm1, %v581_v0, 0  ;;  %v578_v21 = vpack.c.bf16 %v568_v53, %v3776_v32  ;;  %v579_v22 = vpack.c.bf16 %v570_v63, %v569_v50  ;;  %v230_v32 = vld [vmem:[%s4709_s4 + $0x10] sm:$0xff] }
 0x43f   :  { %v554_v11 = vadd.f32 %v3083_v6, %v2787_v54  ;;  %v545_v12 = vpop.f32.mrb[11].mxu0  ;;  %3085 = vmatpush3.bf16.xpose.msra.mxu1 %v608_v10  ;;  %3088 = vmatprep.mubr.msk.bf16.mxu1 %vm138_vm1, %v573_v7  ;;  %v580_v24 = vpack.c.bf16 %v572_v61, %v571_v44  ;;  %v611_v29 = vsel %vm138_vm1, %v582_v55, 0  ;;  %v236_v7 = vld [vmem:[%s4709_s4 + $0x40] sm:$0xff] }
 0x440   :  { %v546_v18 = vadd.f32 %v2787_v54, %v545_v12  ;;  %3261 = vmatprep.subr.msk.bf16.mxu1 %vm138_vm1, %v582_v55  ;;  %v234_v55 = vld [vmem:[%s4709_s4 + $0x30] sm:$0xff] }
 0x441   :  { %v895_v23 = vpack.c.bf16 %v554_v11, %v551_v2  ;;  %v238_v11 = vld [vmem:[%s4709_s4 + $0x50] sm:$0xff] }
 0x442   :  { %v894_v28 = vpack.c.bf16 %v546_v18, %v543_v4 }
 0x444   :  { %3104 = vmatprep.subr.bf16.mxu0 %v894_v28 }
 0x445   :  { %3105 = vmatpush3.bf16.msra.mxu0 %v894_v28 }
 0x446   :  { %3106 = vmatprep.subr.bf16.mxu0 %v895_v23 }
 0x447   :  { %3087 = vmatpush3.bf16.xpose.msra.mxu1 %v611_v29 }
 0x449   :  { %3107 = vmatpush3.bf16.msra.mxu0 %v895_v23 }
 0x44e   :  { %3089 = vmatmul.mubr.msk.bf16.vlgmr.msra.gmra.mrb[4].mxu1 %vm138_vm1, %v574_v62  ;;  %v235_v62 = vld [vmem:[%s4709_s4 + $0x38] sm:$0xff] }
 0x44f   :  { %3092 = vmatprep.mubr.msk.bf16.mxu1 %vm138_vm1, %v575_v8 }
 0x456   :  { %3093 = vmatmul.mubr.msk.bf16.gmra.mrb[8].mxu1 %vm138_vm1, %v576_v16  ;;  %v237_v16 = vld [vmem:[%s4709_s4 + $0x48] sm:$0xff] }
 0x457   :  { %3096 = vmatprep.mubr.msk.bf16.mxu1 %vm138_vm1, %v577_v17 }
 0x45e   :  { %3097 = vmatmul.mubr.msk.bf16.gmra.mrb[12].mxu1 %vm138_vm1, %v578_v21 }
 0x45f   :  { %3100 = vmatprep.mubr.msk.bf16.mxu1 %vm138_vm1, %v579_v22  ;;  %v239_v22 = vld [vmem:[%s4709_s4 + $0x58] sm:$0xff] }
 0x466   :  { %3101 = vmatmul.mubr.msk.bf16.gmra.mrb[16].mxu1 %vm138_vm1, %v580_v24 }
 0x521   :  { %v3090_v31 = vpop.f32.mrb[4].mxu1 }
 0x522   :  { %v647_v33 = vpop.f32.mrb[5].mxu1  ;;  %v3862_v45 = vadd.f32 %v3090_v31, %v230_v32  ;;  %v240_v32 = vld [vmem:[%s4709_s4 + $0x60] sm:$0xff] }
 0x523   :  { %v3857_v38 = vadd.f32 %v647_v33, %v228_v30  ;;  %v3091_v42 = vpop.f32.mrb[6].mxu1 }
 0x524   :  { %v650_v44 = vpop.f32.mrb[7].mxu1  ;;  %v3868_v50 = vadd.f32 %v3091_v42, %v231_v43  ;;  %v716_v54 = vsel %vm138_vm1, %v3862_v45, -inf  ;;  %v242_v42 = vld [vmem:[%s4709_s4 + $0x70] sm:$0xff] }
 0x525   :  { %v3864_v46 = vadd.f32 %v650_v44, %v229_v37  ;;  %v710_v47 = vsel %vm138_vm1, %v3857_v38, -inf  ;;  %v241_v44 = vld [vmem:[%s4709_s4 + $0x68] sm:$0xff] }
 0x526   :  { %711 = vmax.xlane.f32.xlu0 %v710_v47  ;;  %v719_v61 = vsel %vm138_vm1, %v3868_v50, -inf }
 0x527   :  { %v713_v51 = vsel %vm138_vm1, %v3864_v46, -inf }
 0x528   :  { %714 = vmax.xlane.f32.xlu1 %v713_v51 }
 0x529   :  { %v3094_v53 = vpop.f32.mrb[8].mxu1 }
 0x52a   :  { %v663_v56 = vpop.f32.mrb[9].mxu1  ;;  %717 = vmax.xlane.f32.xlu0 %v716_v54  ;;  %v3890_v0 = vadd.f32 %v3094_v53, %v234_v55  ;;  %v243_v53 = vld [vmem:[%s4709_s4 + $0x78] sm:$0xff] }
 0x52b   :  { %v3883_v58 = vadd.f32 %v663_v56, %v232_v52  ;;  %v3095_v59 = vpop.f32.mrb[10].mxu1 }
 0x52c   :  { %v666_v63 = vpop.f32.mrb[11].mxu1  ;;  %720 = vmax.xlane.f32.xlu1 %v719_v61  ;;  %v3896_v4 = vadd.f32 %v3095_v59, %v235_v62  ;;  %v728_v10 = vsel %vm138_vm1, %v3890_v0, -inf }
 0x52d   :  { %v3892_v1 = vadd.f32 %v666_v63, %v233_v57  ;;  %v722_v2 = vsel %vm138_vm1, %v3883_v58, -inf }
 0x52e   :  { %723 = vmax.xlane.f32.xlu0 %v722_v2  ;;  %v731_v21 = vsel %vm138_vm1, %v3896_v4, -inf }
 0x52f   :  { %v725_v6 = vsel %vm138_vm1, %v3892_v1, -inf }
 0x530   :  { %726 = vmax.xlane.f32.xlu1 %v725_v6 }
 0x531   :  { %v3098_v8 = vpop.f32.mrb[12].mxu1 }
 0x532   :  { %v679_v12 = vpop.f32.mrb[13].mxu1  ;;  %729 = vmax.xlane.f32.xlu0 %v728_v10  ;;  %v3918_v24 = vadd.f32 %v3098_v8, %v238_v11 }
 0x533   :  { %v3911_v17 = vadd.f32 %v679_v12, %v236_v7  ;;  %v3099_v18 = vpop.f32.mrb[14].mxu1 }
 0x534   :  { %v682_v23 = vpop.f32.mrb[15].mxu1  ;;  %732 = vmax.xlane.f32.xlu1 %v731_v21  ;;  %v3924_v30 = vadd.f32 %v3099_v18, %v239_v22  ;;  %v740_v37 = vsel %vm138_vm1, %v3918_v24, -inf }
 0x535   :  { %v3920_v28 = vadd.f32 %v682_v23, %v237_v16  ;;  %v734_v29 = vsel %vm138_vm1, %v3911_v17, -inf }
 0x536   :  { %735 = vmax.xlane.f32.xlu0 %v734_v29  ;;  %v743_v52 = vsel %vm138_vm1, %v3924_v30, -inf }
 0x537   :  { %v737_v31 = vsel %vm138_vm1, %v3920_v28, -inf }
 0x538   :  { %738 = vmax.xlane.f32.xlu1 %v737_v31 }
 0x539   :  { %v3102_v33 = vpop.f32.mrb[16].mxu1 }
 0x53a   :  { %v695_v43 = vpop.f32.mrb[17].mxu1  ;;  %741 = vmax.xlane.f32.xlu0 %v740_v37  ;;  %v3946_v55 = vadd.f32 %v3102_v33, %v242_v42 }
 0x53b   :  { %v3939_v47 = vadd.f32 %v695_v43, %v240_v32  ;;  %v3103_v51 = vpop.f32.mrb[18].mxu1 }
 0x53c   :  { %v698_v54 = vpop.f32.mrb[19].mxu1  ;;  %744 = vmax.xlane.f32.xlu1 %v743_v52  ;;  %v3952_v59 = vadd.f32 %v3103_v51, %v243_v53  ;;  %v752_v62 = vsel %vm138_vm1, %v3946_v55, -inf }
 0x53d   :  { %v3948_v56 = vadd.f32 %v698_v54, %v241_v44  ;;  %v746_v57 = vsel %vm138_vm1, %v3939_v47, -inf }
 0x53e   :  { %747 = vmax.xlane.f32.xlu0 %v746_v57  ;;  %v755_v63 = vsel %vm138_vm1, %v3952_v59, -inf }
 0x53f   :  { %v749_v61 = vsel %vm138_vm1, %v3948_v56, -inf }
 0x540   :  { %750 = vmax.xlane.f32.xlu1 %v749_v61 }
 0x542   :  { %753 = vmax.xlane.f32.xlu0 %v752_v62 }
 0x544   :  { %756 = vmax.xlane.f32.xlu1 %v755_v63 }
 0x5b3   :  { %v712_v2 = vpop.xlane.xlu0 %711 }
 0x5b4   :  { %v758_v6 = vsub.f32 %v3857_v38, %v712_v2 }
 0x5b5   :  { %v715_v7 = vpop.xlane.xlu1 %714 }
 0x5b6   :  { %v774_v8 = vmul.f32 1.442695, %v758_v6  ;;  %v759_v10 = vsub.f32 %v3864_v46, %v715_v7 }
 0x5b7   :  { %v718_v11 = vpop.xlane.xlu0 %717 }
 0x5b8   :  { %3324 = vpow2.f32 %v774_v8  ;;  %v776_v12 = vmul.f32 1.442695, %v759_v10  ;;  %v760_v16 = vsub.f32 %v3862_v45, %v718_v11 }
 0x5b9   :  { %v721_v18 = vpop.xlane.xlu1 %720 }
 0x5ba   :  { %3326 = vpow2.f32 %v776_v12  ;;  %v778_v21 = vmul.f32 1.442695, %v760_v16  ;;  %v761_v22 = vsub.f32 %v3868_v50, %v721_v18 }
 0x5bb   :  { %v724_v23 = vpop.xlane.xlu0 %723 }
 0x5bc   :  { %3328 = vpow2.f32 %v778_v21  ;;  %v780_v29 = vmul.f32 1.442695, %v761_v22  ;;  %v762_v31 = vsub.f32 %v3883_v58, %v724_v23 }
 0x5bd   :  { %v727_v38 = vpop.xlane.xlu1 %726 }
 0x5be   :  { %3330 = vpow2.f32 %v780_v29  ;;  %v782_v32 = vmul.f32 1.442695, %v762_v31  ;;  %v763_v46 = vsub.f32 %v3892_v1, %v727_v38 }
 0x5bf   :  { %v730_v33 = vpop.xlane.xlu0 %729 }
 0x5c0   :  { %3332 = vpow2.f32 %v782_v32  ;;  %v784_v37 = vmul.f32 1.442695, %v763_v46  ;;  %v764_v45 = vsub.f32 %v3890_v0, %v730_v33 }
 0x5c1   :  { %v733_v42 = vpop.xlane.xlu1 %732 }
 0x5c2   :  { %v3967_v43 = vpop.eup %3324  ;;  %3334 = vpow2.f32 %v784_v37  ;;  %v786_v50 = vmul.f32 1.442695, %v764_v45  ;;  %v765_v44 = vsub.f32 %v3896_v4, %v733_v42 }
 0x5c3   :  { %v736_v51 = vpop.xlane.xlu0 %735  ;;  %v806_v58 = vsel %vm138_vm1, %v3967_v43, 0.0 }
 0x5c4   :  { %v3972_v52 = vpop.eup %3326  ;;  %3336 = vpow2.f32 %v786_v50  ;;  %v788_v1 = vmul.f32 1.442695, %v765_v44  ;;  %v766_v53 = vsub.f32 %v3911_v17, %v736_v51  ;;  %807 = vadd.xlane.f32.xlu0 %v806_v58 }
 0x5c5   :  { %v739_v54 = vpop.xlane.xlu1 %738  ;;  %v809_v0 = vsel %vm138_vm1, %v3972_v52, 0.0 }
 0x5c6   :  { %v3977_v57 = vpop.eup %3328  ;;  %3338 = vpow2.f32 %v788_v1  ;;  %v790_v61 = vmul.f32 1.442695, %v766_v53  ;;  %v767_v4 = vsub.f32 %v3920_v28, %v739_v54  ;;  %810 = vadd.xlane.f32.xlu1 %v809_v0 }
 0x5c7   :  { %v742_v62 = vpop.xlane.xlu0 %741  ;;  %v812_v63 = vsel %vm138_vm1, %v3977_v57, 0.0 }
 0x5c8   :  { %v3982_v2 = vpop.eup %3330  ;;  %3340 = vpow2.f32 %v790_v61  ;;  %v792_v17 = vmul.f32 1.442695, %v767_v4  ;;  %v768_v6 = vsub.f32 %v3918_v24, %v742_v62  ;;  %813 = vadd.xlane.f32.xlu0 %v812_v63 }
 0x5c9   :  { %v745_v7 = vpop.xlane.xlu1 %744  ;;  %v815_v8 = vsel %vm138_vm1, %v3982_v2, 0.0 }
 0x5ca   :  { %v3987_v10 = vpop.eup %3332  ;;  %3342 = vpow2.f32 %v792_v17  ;;  %v794_v28 = vmul.f32 1.442695, %v768_v6  ;;  %v769_v11 = vsub.f32 %v3924_v30, %v745_v7  ;;  %816 = vadd.xlane.f32.xlu1 %v815_v8 }
 0x5cb   :  { %v748_v12 = vpop.xlane.xlu0 %747  ;;  %v818_v16 = vsel %vm138_vm1, %v3987_v10, 0.0 }
 0x5cc   :  { %v3992_v18 = vpop.eup %3334  ;;  %3344 = vpow2.f32 %v794_v28  ;;  %v796_v24 = vmul.f32 1.442695, %v769_v11  ;;  %v770_v21 = vsub.f32 %v3939_v47, %v748_v12  ;;  %819 = vadd.xlane.f32.xlu0 %v818_v16 }
 0x5cd   :  { %v751_v22 = vpop.xlane.xlu1 %750  ;;  %v821_v23 = vsel %vm138_vm1, %v3992_v18, 0.0 }
 0x5ce   :  { %v3997_v29 = vpop.eup %3336  ;;  %3346 = vpow2.f32 %v796_v24  ;;  %v798_v30 = vmul.f32 1.442695, %v770_v21  ;;  %v771_v31 = vsub.f32 %v3948_v56, %v751_v22  ;;  %822 = vadd.xlane.f32.xlu1 %v821_v23 }
 0x5cf   :  { %v754_v38 = vpop.xlane.xlu0 %753  ;;  %v824_v32 = vsel %vm138_vm1, %v3997_v29, 0.0 }
 0x5d0   :  { %v4002_v46 = vpop.eup %3338  ;;  %3348 = vpow2.f32 %v798_v30  ;;  %v800_v47 = vmul.f32 1.442695, %v771_v31  ;;  %v772_v33 = vsub.f32 %v3946_v55, %v754_v38  ;;  %825 = vadd.xlane.f32.xlu0 %v824_v32 }
 0x5d1   :  { %v757_v37 = vpop.xlane.xlu1 %756  ;;  %v827_v45 = vsel %vm138_vm1, %v4002_v46, 0.0 }
 0x5d2   :  { %v4007_v42 = vpop.eup %3340  ;;  %3350 = vpow2.f32 %v800_v47  ;;  %v802_v56 = vmul.f32 1.442695, %v772_v33  ;;  %v773_v50 = vsub.f32 %v3952_v59, %v757_v37  ;;  %828 = vadd.xlane.f32.xlu1 %v827_v45 }
 0x5d3   :  { %v830_v44 = vsel %vm138_vm1, %v4007_v42, 0.0 }
 0x5d4   :  { %v4012_v51 = vpop.eup %3342  ;;  %3352 = vpow2.f32 %v802_v56  ;;  %v804_v58 = vmul.f32 1.442695, %v773_v50  ;;  %831 = vadd.xlane.f32.xlu0 %v830_v44 }
 0x5d5   :  { %v833_v55 = vsel %vm138_vm1, %v4012_v51, 0.0 }
 0x5d6   :  { %v4016_v1 = vpop.eup %3344  ;;  %3354 = vpow2.f32 %v804_v58  ;;  %834 = vadd.xlane.f32.xlu1 %v833_v55 }
 0x5d7   :  { %v836_v53 = vsel %vm138_vm1, %v4016_v1, 0.0 }
 0x5d8   :  { %v4020_v59 = vpop.eup %3346  ;;  %837 = vadd.xlane.f32.xlu0 %v836_v53 }
 0x5d9   :  { %v839_v54 = vsel %vm138_vm1, %v4020_v59, 0.0 }
 0x5da   :  { %v4024_v0 = vpop.eup %3348  ;;  %840 = vadd.xlane.f32.xlu1 %v839_v54 }
 0x5db   :  { %v842_v61 = vsel %vm138_vm1, %v4024_v0, 0.0 }
 0x5dc   :  { %v4028_v4 = vpop.eup %3350  ;;  %843 = vadd.xlane.f32.xlu0 %v842_v61 }
 0x5dd   :  { %v845_v62 = vsel %vm138_vm1, %v4028_v4, 0.0 }
 0x5de   :  { %v4032_v63 = vpop.eup %3352  ;;  %846 = vadd.xlane.f32.xlu1 %v845_v62 }
 0x5df   :  { %v848_v17 = vsel %vm138_vm1, %v4032_v63, 0.0 }
 0x5e0   :  { %v4036_v6 = vpop.eup %3354  ;;  %849 = vadd.xlane.f32.xlu0 %v848_v17 }
 0x5e1   :  { %v851_v7 = vsel %vm138_vm1, %v4036_v6, 0.0 }
 0x5e2   :  { %852 = vadd.xlane.f32.xlu1 %v851_v7 }
 0x651   :  { %v808_v8 = vpop.xlane.xlu0 %807 }
 0x652   :  { %3356 = vrcp.f32 %v808_v8 }
 0x653   :  { %v811_v28 = vpop.xlane.xlu1 %810 }
 0x654   :  { %3358 = vrcp.f32 %v811_v28 }
 0x655   :  { %v814_v11 = vpop.xlane.xlu0 %813 }
 0x656   :  { %3360 = vrcp.f32 %v814_v11 }
 0x657   :  { %v817_v12 = vpop.xlane.xlu1 %816 }
 0x658   :  { %3362 = vrcp.f32 %v817_v12 }
 0x659   :  { %v820_v16 = vpop.xlane.xlu0 %819 }
 0x65a   :  { %3364 = vrcp.f32 %v820_v16 }
 0x65b   :  { %v823_v24 = vpop.xlane.xlu1 %822 }
 0x65c   :  { %v3357_v21 = vpop.eup %3356  ;;  %3366 = vrcp.f32 %v823_v24 }
 0x65d   :  { %v826_v22 = vpop.xlane.xlu0 %825  ;;  %v870_v31 = vmul.f32 %v3357_v21, %v3967_v43 }
 0x65e   :  { %v3359_v23 = vpop.eup %3358  ;;  %3368 = vrcp.f32 %v826_v22 }
 0x65f   :  { %v829_v30 = vpop.xlane.xlu1 %828  ;;  %v871_v38 = vmul.f32 %v3359_v23, %v3972_v52 }
 0x660   :  { %v3361_v32 = vpop.eup %3360  ;;  %3370 = vrcp.f32 %v829_v30 }
 0x661   :  { %v832_v47 = vpop.xlane.xlu0 %831  ;;  %v886_v33 = vpack.c.bf16 %v871_v38, %v870_v31  ;;  %v872_v45 = vmul.f32 %v3361_v32, %v3977_v57 }
 0x662   :  { %v3363_v37 = vpop.eup %3362  ;;  %3372 = vrcp.f32 %v832_v47 }
 0x663   :  { %v873_v56 = vmul.f32 %v3363_v37, %v3982_v2  ;;  %v835_v50 = vpop.xlane.xlu1 %834  ;;  %3108 = vmatprep.mubr.msk.bf16.mxu0 %vm138_vm1, %v886_v33 }
 0x664   :  { %v3365_v44 = vpop.eup %3364  ;;  %3374 = vrcp.f32 %v835_v50 }
 0x665   :  { %v838_v58 = vpop.xlane.xlu0 %837  ;;  %v887_v55 = vpack.c.bf16 %v873_v56, %v872_v45  ;;  %v874_v53 = vmul.f32 %v3365_v44, %v3987_v10 }
 0x666   :  { %v3367_v43 = vpop.eup %3366  ;;  %3376 = vrcp.f32 %v838_v58 }
 0x667   :  { %v841_v52 = vpop.xlane.xlu1 %840  ;;  %3109 = vmatmul.mubr.msk.bf16.vlgmr.msra.gmra.mrb[12].mxu0 %vm138_vm1, %v887_v55  ;;  %v875_v54 = vmul.f32 %v3367_v43, %v3992_v18 }
 0x668   :  { %v3369_v61 = vpop.eup %3368  ;;  %3378 = vrcp.f32 %v841_v52 }
 0x669   :  { %v844_v57 = vpop.xlane.xlu0 %843  ;;  %v888_v2 = vpack.c.bf16 %v875_v54, %v874_v53  ;;  %v876_v7 = vmul.f32 %v3369_v61, %v3997_v29 }
 0x66a   :  { %v3371_v62 = vpop.eup %3370  ;;  %3380 = vrcp.f32 %v844_v57 }
 0x66b   :  { %v847_v17 = vpop.xlane.xlu1 %846  ;;  %3112 = vmatprep.mubr.msk.bf16.mxu0 %vm138_vm1, %v888_v2  ;;  %v877_v8 = vmul.f32 %v3371_v62, %v4002_v46 }
 0x66c   :  { %v3373_v28 = vpop.eup %3372  ;;  %3382 = vrcp.f32 %v847_v17 }
 0x66d   :  { %v850_v11 = vpop.xlane.xlu0 %849  ;;  %v889_v12 = vpack.c.bf16 %v877_v8, %v876_v7  ;;  %v878_v16 = vmul.f32 %v3373_v28, %v4007_v42 }
 0x66e   :  { %v3375_v10 = vpop.eup %3374  ;;  %3384 = vrcp.f32 %v850_v11 }
 0x66f   :  { %v853_v18 = vpop.xlane.xlu1 %852  ;;  %3113 = vmatmul.mubr.msk.bf16.gmra.mrb[16].mxu0 %vm138_vm1, %v889_v12  ;;  %v879_v24 = vmul.f32 %v3375_v10, %v4012_v51 }
 0x670   :  { %v3377_v21 = vpop.eup %3376  ;;  %3386 = vrcp.f32 %v853_v18 }
 0x671   :  { %v890_v22 = vpack.c.bf16 %v879_v24, %v878_v16  ;;  %v880_v29 = vmul.f32 %v3377_v21, %v4016_v1 }
 0x672   :  { %v3379_v23 = vpop.eup %3378 }
 0x673   :  { %3116 = vmatprep.mubr.msk.bf16.mxu0 %vm138_vm1, %v890_v22  ;;  %v881_v46 = vmul.f32 %v3379_v23, %v4020_v59  ;;  %v3278_v59 = vld [vmem:[%s4712_s7 + $0x30] sm:$0xff]  }
 0x674   :  { %v3381_v30 = vpop.eup %3380  ;;  %3124 = vmatprep.subr.bf16.mxu1 %v3278_v59 }
 0x675   :  { %v891_v31 = vpack.c.bf16 %v881_v46, %v880_v29  ;;  %v882_v32 = vmul.f32 %v3381_v30, %v4024_v0  ;;  %3125 = vmatpush3.bf16.msra.mxu1 %v3278_v59  ;;  %v3279_v0 = vld [vmem:[%s4712_s7 + $0x38] sm:$0xff]  }
 0x676   :  { %v3383_v38 = vpop.eup %3382  ;;  %3126 = vmatprep.subr.bf16.mxu1 %v3279_v0 }
 0x677   :  { %3117 = vmatmul.mubr.msk.bf16.gmra.mrb[20].mxu0 %vm138_vm1, %v891_v31  ;;  %v883_v42 = vmul.f32 %v3383_v38, %v4028_v4 }
 0x678   :  { %v3385_v51 = vpop.eup %3384 }
 0x679   :  { %v892_v47 = vpack.c.bf16 %v883_v42, %v882_v32  ;;  %v884_v37 = vmul.f32 %v3385_v51, %v4032_v63  ;;  %3127 = vmatpush3.bf16.msra.mxu1 %v3279_v0 }
 0x67a   :  { %v3387_v33 = vpop.eup %3386 }
 0x67b   :  { %3120 = vmatprep.mubr.msk.bf16.mxu0 %vm138_vm1, %v892_v47  ;;  %v885_v1 = vmul.f32 %v3387_v33, %v4036_v6 }
 0x67d   :  { %v893_v45 = vpack.c.bf16 %v885_v1, %v884_v37 }
 0x67f   :  { %3121 = vmatmul.mubr.msk.bf16.gmra.mrb[24].mxu0 %vm138_vm1, %v893_v45 }
 0x73a   :  { %v3110_v4 = vpop.f32.mrb[12].mxu0 }
 0x73b   :  { %v954_v56 = vpop.f32.mrb[13].mxu0  ;;  %v1019_v44 = vmul.f32 %v3110_v4, %v3734_v13 }
 0x73c   :  { %v3111_v63 = vpop.f32.mrb[14].mxu0  ;;  %v1017_v43 = vmul.f32 %v954_v56, %v3754_v20 }
 0x73d   :  { %v957_v50 = vpop.f32.mrb[15].mxu0  ;;  %v1020_v54 = vmul.f32 %v3111_v63, %v3781_v34 }
 0x73e   :  { %v1018_v62 = vmul.f32 %v957_v50, %v3796_v39 }
 0x742   :  { %v3114_v6 = vpop.f32.mrb[16].mxu0 }
 0x743   :  { %v1023_v58 = vmul.f32 %v3114_v6, %v3739_v14  ;;  %v970_v55 = vpop.f32.mrb[17].mxu0 }
 0x744   :  { %v1021_v52 = vmul.f32 %v970_v55, %v3759_v25  ;;  %v3115_v53 = vpop.f32.mrb[18].mxu0 }
 0x745   :  { %v1035_v61 = vadd.f32 %v1023_v58, %v1019_v44  ;;  %v1024_v57 = vmul.f32 %v3115_v53, %v3786_v35  ;;  %v973_v2 = vpop.f32.mrb[19].mxu0 }
 0x746   :  { %v1033_v17 = vadd.f32 %v1021_v52, %v1017_v43  ;;  %v1022_v7 = vmul.f32 %v973_v2, %v3801_v40 }
 0x747   :  { %v1036_v13 = vadd.f32 %v1024_v57, %v1020_v54 }
 0x748   :  { %v1034_v8 = vadd.f32 %v1022_v7, %v1018_v62 }
 0x74a   :  { %v3118_v14 = vpop.f32.mrb[20].mxu0 }
 0x74b   :  { %v1027_v28 = vmul.f32 %v3118_v14, %v3744_v15  ;;  %v986_v20 = vpop.f32.mrb[21].mxu0  ;;  %v3281_v14 = vld [vmem:[%s4713_s8 + $0x8] sm:$0xff]  }
 0x74c   :  { %v1025_v25 = vmul.f32 %v986_v20, %v3764_v26  ;;  %v3119_v11 = vpop.f32.mrb[22].mxu0 }
 0x74d   :  { %v1039_v12 = vadd.f32 %v1035_v61, %v1027_v28  ;;  %v1028_v34 = vmul.f32 %v3119_v11, %v3791_v36  ;;  %v989_v10 = vpop.f32.mrb[23].mxu0 }
 0x74e   :  { %v1037_v35 = vadd.f32 %v1033_v17, %v1025_v25  ;;  %v1026_v18 = vmul.f32 %v989_v10, %v3806_v41 }
 0x74f   :  { %v1040_v39 = vadd.f32 %v1036_v13, %v1028_v34 }
 0x750   :  { %v1038_v16 = vadd.f32 %v1034_v8, %v1026_v18  ;;  %v3280_v8 = vld [vmem:[%s4713_s8] sm:$0xff]  }
 0x751   :  { %3132 = vmatprep.subr.bf16.mxu1 %v3280_v8 }
 0x752   :  { %v3122_v24 = vpop.f32.mrb[24].mxu0 }
 0x753   :  { %v1031_v40 = vmul.f32 %v3122_v24, %v3749_v19  ;;  %v1002_v21 = vpop.f32.mrb[25].mxu0 }
 0x754   :  { %v1029_v22 = vmul.f32 %v1002_v21, %v3769_v27  ;;  %v3123_v15 = vpop.f32.mrb[26].mxu0  ;;  %v2816_v27 = vld [vmem:[%s4710_s5 + $0x9] ss:$0 sm:$0xff]  ;;  %v2817_v21 = vld [vmem:[%s4710_s5 + $0xa] ss:$0 sm:$0xff] }
 0x755   :  { %v1043_v23 = vadd.f32 %v1039_v12, %v1031_v40  ;;  %v1032_v26 = vmul.f32 %v3123_v15, %v3815_v48  ;;  %v1005_v29 = vpop.f32.mrb[27].mxu0 }
 0x756   :  { %v1041_v46 = vadd.f32 %v1037_v35, %v1029_v22  ;;  %v1030_v36 = vmul.f32 %v1005_v29, %v3820_v49 }
 0x757   :  { %v1044_v30 = vadd.f32 %v1040_v39, %v1032_v26 }
 0x758   :  { %v1042_v31 = vadd.f32 %v1038_v16, %v1030_v36 }
 0x759   :  { %v1046_v38 = vpack.c.bf16 %v1044_v30, %v1043_v23 }
 0x75a   :  { %v1045_v41 = vpack.c.bf16 %v1042_v31, %v1041_v46  ;;  %v2818_v46 = vld [vmem:[%s4710_s5 + $0xb] ss:$0 sm:$0xff] }
 0x75c   :  { %3128 = vmatprep.mubr.msk.bf16.mxu1 %vm138_vm1, %v1045_v41 }
 0x75d   :  { %3129 = vmatmul.mubr.msk.bf16.vlgmr.msra.gmra.mrb[20].mxu1 %vm138_vm1, %v1046_v38 }
 0x75e   :  { %3133 = vmatpush3.bf16.msra.mxu1 %v3280_v8 }
 0x75f   :  { %3134 = vmatprep.subr.bf16.mxu1 %v3281_v14 }
 0x762   :  { %3135 = vmatpush3.bf16.msra.mxu1 %v3281_v14 }
 0x830   :  { %v3130_v19 = vpop.f32.mrb[20].mxu1 }
 0x831   :  { %v1104_v32 = vpop.f32.mrb[21].mxu1  ;;  %v1121_v48 = vadd.f32 %v3130_v19, %v3677_v5 }
 0x832   :  { %v1119_v42 = vadd.f32 %v1104_v32, %v3671_v60  ;;  %v3131_v51 = vpop.f32.mrb[22].mxu1 }
 0x833   :  { %v1107_v49 = vpop.f32.mrb[23].mxu1  ;;  %v1122_v33 = vadd.f32 %v3131_v51, %v3683_v9  ;;  %v4097_v1 = vadd.f32 %v2816_v27, %v1121_v48 }
 0x834   :  { %v4093_v47 = vadd.f32 %v2816_v27, %v1119_v42  ;;  %v1120_v37 = vadd.f32 %v1107_v49, %v3675_v3 }
 0x835   :  { %v4103_v0 = vadd.f32 %v2816_v27, %v1122_v33  ;;  %v1139_v5 = vsel %vm138_vm1, %v4097_v1, 0.0  ;;  %v3282_v33 = vld [vmem:[%s4714_s9] sm:$0xff]  }
 0x836   :  { %v4099_v45 = vadd.f32 %v2816_v27, %v1120_v37  ;;  %v1133_v59 = vsel %vm138_vm1, %v4093_v47, 0.0  ;;  %3140 = vmatprep.subr.bf16.mxu0 %v3282_v33  ;;  %v3283_v37 = vld [vmem:[%s4714_s9 + $0x8] sm:$0xff]  }
 0x837   :  { %1134 = vadd.xlane.f32.xlu0 %v1133_v59  ;;  %v1142_v3 = vsel %vm138_vm1, %v4103_v0, 0.0  ;;  %3141 = vmatpush3.bf16.msra.mxu0 %v3282_v33  ;;  %v3284_v59 = vld [vmem:[%s4714_s9 + $0x10] sm:$0xff]  }
 0x838   :  { %v1136_v60 = vsel %vm138_vm1, %v4099_v45, 0.0  ;;  %3142 = vmatprep.subr.bf16.mxu0 %v3283_v37 }
 0x839   :  { %1137 = vadd.xlane.f32.xlu1 %v1136_v60  ;;  %v3285_v60 = vld [vmem:[%s4714_s9 + $0x18] sm:$0xff]  }
 0x83b   :  { %1140 = vadd.xlane.f32.xlu0 %v1139_v5  ;;  %3143 = vmatpush3.bf16.msra.mxu0 %v3283_v37  ;;  %v3286_v5 = vld [vmem:[%s4714_s9 + $0x20] sm:$0xff]  }
 0x83c   :  { %3144 = vmatprep.subr.bf16.mxu0 %v3284_v59 }
 0x83d   :  { %1143 = vadd.xlane.f32.xlu1 %v1142_v3  ;;  %v3287_v3 = vld [vmem:[%s4714_s9 + $0x28] sm:$0xff]  }
 0x83f   :  { %3145 = vmatpush3.bf16.msra.mxu0 %v3284_v59 }
 0x840   :  { %3146 = vmatprep.subr.bf16.mxu0 %v3285_v60 }
 0x843   :  { %3147 = vmatpush3.bf16.msra.mxu0 %v3285_v60 }
 0x844   :  { %3148 = vmatprep.subr.bf16.mxu0 %v3286_v5 }
 0x847   :  { %3149 = vmatpush3.bf16.msra.mxu0 %v3286_v5 }
 0x848   :  { %3150 = vmatprep.subr.bf16.mxu0 %v3287_v3 }
 0x84b   :  { %3151 = vmatpush3.bf16.msra.mxu0 %v3287_v3 }
 0x8c4   :  { %v1135_v9 = vpop.xlane.xlu0 %1134 }
 0x8c5   :  { %v1145_v4 = vmul.f32 0.03125, %v1135_v9  ;;  %v3288_v9 = vld [vmem:[%s4714_s9 + $0x30] sm:$0xff]  }
 0x8c6   :  { %v1138_v56 = vpop.xlane.xlu1 %1137  ;;  %3152 = vmatprep.subr.bf16.mxu0 %v3288_v9 }
 0x8c7   :  { %v1149_v63 = vsub.f32 %v4093_v47, %v1145_v4  ;;  %v1146_v50 = vmul.f32 0.03125, %v1138_v56  ;;  %3153 = vmatpush3.bf16.msra.mxu0 %v3288_v9  ;;  %v3289_v4 = vld [vmem:[%s4714_s9 + $0x38] sm:$0xff]   ;;  %v2819_v56 = vld [vmem:[%s4711_s6] ss:$0 sm:$0xff] }
 0x8c8   :  { %v1141_v6 = vpop.xlane.xlu0 %1140  ;;  %3154 = vmatprep.subr.bf16.mxu0 %v3289_v4 }
 0x8c9   :  { %v1150_v44 = vsub.f32 %v4099_v45, %v1146_v50  ;;  %v1147_v58 = vmul.f32 0.03125, %v1141_v6  ;;  %v1153_v55 = vmul.f32 %v1149_v63, %v1149_v63 }
 0x8ca   :  { %v1144_v43 = vpop.xlane.xlu1 %1143 }
 0x8cb   :  { %v1151_v52 = vsub.f32 %v4097_v1, %v1147_v58  ;;  %v1148_v53 = vmul.f32 0.03125, %v1144_v43  ;;  %v1157_v54 = vsel %vm138_vm1, %v1153_v55, 0.0  ;;  %v1154_v61 = vmul.f32 %v1150_v44, %v1150_v44  ;;  %3155 = vmatpush3.bf16.msra.mxu0 %v3289_v4 }
 0x8cc   :  { %1158 = vadd.xlane.f32.xlu0 %v1157_v54 }
 0x8cd   :  { %v1152_v57 = vsub.f32 %v4103_v0, %v1148_v53  ;;  %v1160_v2 = vsel %vm138_vm1, %v1154_v61, 0.0  ;;  %v1155_v62 = vmul.f32 %v1151_v52, %v1151_v52 }
 0x8ce   :  { %1161 = vadd.xlane.f32.xlu1 %v1160_v2 }
 0x8cf   :  { %v1163_v17 = vsel %vm138_vm1, %v1155_v62, 0.0  ;;  %v1156_v7 = vmul.f32 %v1152_v57, %v1152_v57 }
 0x8d0   :  { %1164 = vadd.xlane.f32.xlu0 %v1163_v17 }
 0x8d1   :  { %v1166_v13 = vsel %vm138_vm1, %v1156_v7, 0.0 }
 0x8d2   :  { %1167 = vadd.xlane.f32.xlu1 %v1166_v13 }
 0x959   :  { %v1159_v28 = vpop.xlane.xlu0 %1158 }
 0x95a   :  { %v1169_v20 = vmul.f32 0.03125, %v1159_v28 }
 0x95b   :  { %v1162_v25 = vpop.xlane.xlu1 %1161 }
 0x95c   :  { %v1173_v11 = vadd.f32 1e-05, %v1169_v20  ;;  %v1170_v12 = vmul.f32 0.03125, %v1162_v25 }
 0x95d   :  { %v1165_v34 = vpop.xlane.xlu0 %1164 }
 0x95e   :  { %3388 = vrsqrt.f32 %v1173_v11  ;;  %v1174_v10 = vadd.f32 1e-05, %v1170_v12  ;;  %v1171_v35 = vmul.f32 0.03125, %v1165_v34 }
 0x95f   :  { %v1168_v18 = vpop.xlane.xlu1 %1167 }
 0x960   :  { %3390 = vrsqrt.f32 %v1174_v10  ;;  %v1175_v39 = vadd.f32 1e-05, %v1171_v35  ;;  %v1172_v16 = vmul.f32 0.03125, %v1168_v18 }
 0x962   :  { %3392 = vrsqrt.f32 %v1175_v39  ;;  %v1176_v24 = vadd.f32 1e-05, %v1172_v16 }
 0x964   :  { %3394 = vrsqrt.f32 %v1176_v24 }
 0x968   :  { %v3389_v40 = vpop.eup %3388 }
 0x969   :  { %v1181_v22 = vmul.f32 %v3389_v40, %v1149_v63 }
 0x96a   :  { %v3391_v15 = vpop.eup %3390 }
 0x96b   :  { %v1182_v23 = vmul.f32 %v3391_v15, %v1150_v44  ;;  %v1191_v26 = vmul.f32 %v2817_v21, %v1181_v22 }
 0x96c   :  { %v3393_v29 = vpop.eup %3392 }
 0x96d   :  { %v1183_v36 = vmul.f32 %v3393_v29, %v1151_v52  ;;  %v1192_v30 = vmul.f32 %v2817_v21, %v1182_v23  ;;  %v1201_v19 = vadd.f32 %v2818_v46, %v1191_v26  ;;  %v2836_v23 = vld [vmem:[%s4710_s5 + $0xc] ss:$0 sm:$0xff] }
 0x96e   :  { %v3395_v31 = vpop.eup %3394 }
 0x96f   :  { %v1193_v38 = vmul.f32 %v2817_v21, %v1183_v36  ;;  %v1184_v41 = vmul.f32 %v3395_v31, %v1152_v57  ;;  %v1202_v27 = vadd.f32 %v2818_v46, %v1192_v30 }
 0x971   :  { %v1194_v32 = vmul.f32 %v2817_v21, %v1184_v41  ;;  %v1205_v48 = vpack.c.bf16 %v1202_v27, %v1201_v19  ;;  %v1203_v42 = vadd.f32 %v2818_v46, %v1193_v38 }
 0x973   :  { %3136 = vmatprep.mubr.msk.bf16.mxu1 %vm138_vm1, %v1205_v48  ;;  %v1204_v51 = vadd.f32 %v2818_v46, %v1194_v32 }
 0x975   :  { %v1206_v49 = vpack.c.bf16 %v1204_v51, %v1203_v42 }
 0x977   :  { %3137 = vmatmul.mubr.msk.bf16.vlgmr.msra.gmra.mrb[24].mxu1 %vm138_vm1, %v1206_v49 }
 0xa4a   :  { %v3138_v63 = vpop.f32.mrb[24].mxu1 }
 0xa4b   :  { %v1279_v50 = vadd.f32 %v3138_v63, %v2819_v56  ;;  %v1270_v6 = vpop.f32.mrb[25].mxu1 }
 0xa4c   :  { %v1271_v44 = vadd.f32 %v2819_v56, %v1270_v6  ;;  %v3139_v58 = vpop.f32.mrb[26].mxu1 }
 0xa4d   :  { %v2826_v55 = vmul.f32 -1.702, %v1279_v50  ;;  %v1282_v43 = vadd.f32 %v3139_v58, %v2819_v56  ;;  %v1273_v52 = vpop.f32.mrb[27].mxu1 }
 0xa4e   :  { %v2824_v53 = vmul.f32 -1.702, %v1271_v44  ;;  %v1274_v54 = vadd.f32 %v2819_v56, %v1273_v52  ;;  %v3290_v52 = vld [vmem:[%s4712_s7 + $0x40] sm:$0xff]  }
 0xa4f   :  { %v1297_v61 = vmul.f32 1.442695, %v2826_v55  ;;  %v2827_v57 = vmul.f32 -1.702, %v1282_v43  ;;  %3160 = vmatprep.subr.bf16.mxu1 %v3290_v52 }
 0xa50   :  { %v1293_v2 = vmul.f32 1.442695, %v2824_v53  ;;  %v2825_v62 = vmul.f32 -1.702, %v1274_v54  ;;  %v3291_v53 = vld [vmem:[%s4712_s7 + $0x48] sm:$0xff]   ;;  %3161 = vmatpush3.bf16.msra.mxu1 %v3290_v52 }
 0xa51   :  { %3396 = vpow2.f32 %v1297_v61  ;;  %v1299_v17 = vmul.f32 1.442695, %v2827_v57  ;;  %3162 = vmatprep.subr.bf16.mxu1 %v3291_v53 }
 0xa52   :  { %3398 = vpow2.f32 %v1293_v2  ;;  %v1295_v7 = vmul.f32 1.442695, %v2825_v62 }
 0xa53   :  { %3400 = vpow2.f32 %v1299_v17 }
 0xa54   :  { %3402 = vpow2.f32 %v1295_v7  ;;  %3163 = vmatpush3.bf16.msra.mxu1 %v3291_v53  ;;  %v4281_v53 = vld [vmem:[%s4708_s3 + $0x18] sm:$0xff] }
 0xa5b   :  { %v3397_v13 = vpop.eup %3396 }
 0xa5c   :  { %v3399_v8 = vpop.eup %3398  ;;  %v1303_v14 = vadd.f32 1.0, %v3397_v13 }
 0xa5d   :  { %v3401_v28 = vpop.eup %3400  ;;  %v1301_v20 = vadd.f32 1.0, %v3399_v8 }
 0xa5e   :  { %v3403_v25 = vpop.eup %3402  ;;  %3404 = vrcp.f32 %v1303_v14  ;;  %v1304_v11 = vadd.f32 1.0, %v3401_v28 }
 0xa5f   :  { %3406 = vrcp.f32 %v1301_v20  ;;  %v1302_v12 = vadd.f32 1.0, %v3403_v25 }
 0xa60   :  { %3408 = vrcp.f32 %v1304_v11 }
 0xa61   :  { %3410 = vrcp.f32 %v1302_v12  ;;  %v2846_v12 = vld [vmem:[%s4710_s5 + $0xd] ss:$0 sm:$0xff] }
 0xa68   :  { %v3405_v34 = vpop.eup %3404 }
 0xa69   :  { %v3407_v10 = vpop.eup %3406  ;;  %v1315_v39 = vmul.f32 %v3405_v34, %v1279_v50 }
 0xa6a   :  { %v3409_v35 = vpop.eup %3408  ;;  %v1313_v24 = vmul.f32 %v3407_v10, %v1271_v44 }
 0xa6b   :  { %v3411_v18 = vpop.eup %3410  ;;  %v1316_v16 = vmul.f32 %v3409_v35, %v1282_v43 }
 0xa6c   :  { %v1314_v40 = vmul.f32 %v3411_v18, %v1274_v54  ;;  %v3292_v54 = vld [vmem:[%s4712_s7 + $0x50] sm:$0xff]  }
 0xa6d   :  { %v1318_v21 = vpack.c.bf16 %v1316_v16, %v1315_v39  ;;  %3168 = vmatprep.subr.bf16.mxu1 %v3292_v54  ;;  %v2847_v16 = vld [vmem:[%s4710_s5 + $0xe] ss:$0 sm:$0xff] }
 0xa6e   :  { %v1317_v22 = vpack.c.bf16 %v1314_v40, %v1313_v24 }
 0xa70   :  { %3156 = vmatprep.mubr.bf16.mxu0 %v1317_v22 }
 0xa71   :  { %3157 = vmatmul.mubr.bf16.vlgmr.msra.gmra.mrb[28].mxu0 %v1318_v21 }
 0xb44   :  { %v3158_v15 = vpop.f32.mrb[28].mxu0 }
 0xb45   :  { %v1417_v26 = vpop.f32.mrb[29].mxu0  ;;  %v1434_v29 = vadd.f32 %v3158_v15, %v4097_v1 }
 0xb46   :  { %v1432_v46 = vadd.f32 %v1417_v26, %v4093_v47  ;;  %v3159_v36 = vpop.f32.mrb[30].mxu0 }
 0xb47   :  { %v1420_v30 = vpop.f32.mrb[31].mxu0  ;;  %v1435_v38 = vadd.f32 %v3159_v36, %v4103_v0  ;;  %v4169_v19 = vadd.f32 %v2836_v23, %v1434_v29 }
 0xb48   :  { %v4165_v31 = vadd.f32 %v2836_v23, %v1432_v46  ;;  %v1433_v41 = vadd.f32 %v1420_v30, %v4099_v45 }
 0xb49   :  { %v4175_v48 = vadd.f32 %v2836_v23, %v1435_v38  ;;  %v1470_v1 = vsel %vm138_vm1, %v4169_v19, 0.0 }
 0xb4a   :  { %v4171_v27 = vadd.f32 %v2836_v23, %v1433_v41  ;;  %v1464_v32 = vsel %vm138_vm1, %v4165_v31, 0.0  ;;  %v3293_v41 = vld [vmem:[%s4712_s7 + $0x58] sm:$0xff]  }
 0xb4b   :  { %1465 = vadd.xlane.f32.xlu0 %v1464_v32  ;;  %v1473_v45 = vsel %vm138_vm1, %v4175_v48, 0.0  ;;  %v3294_v32 = vld [vmem:[%s4712_s7 + $0x60] sm:$0xff]  }
 0xb4c   :  { %v1467_v47 = vsel %vm138_vm1, %v4171_v27, 0.0 }
 0xb4d   :  { %1468 = vadd.xlane.f32.xlu1 %v1467_v47  ;;  %v3295_v47 = vld [vmem:[%s4712_s7 + $0x68] sm:$0xff]  }
 0xb4f   :  { %1471 = vadd.xlane.f32.xlu0 %v1470_v1  ;;  %v2852_v1 = vld [vmem:[%s4710_s5 + $0xf] ss:$0 sm:$0xff] }
 0xb51   :  { %1474 = vadd.xlane.f32.xlu1 %v1473_v45 }
 0xbd8   :  { %v1466_v0 = vpop.xlane.xlu0 %1465 }
 0xbd9   :  { %v1476_v42 = vmul.f32 0.03125, %v1466_v0 }
 0xbda   :  { %v1469_v51 = vpop.xlane.xlu1 %1468 }
 0xbdb   :  { %v1480_v49 = vsub.f32 %v4165_v31, %v1476_v42  ;;  %v1477_v33 = vmul.f32 0.03125, %v1469_v51 }
 0xbdc   :  { %v1472_v37 = vpop.xlane.xlu0 %1471 }
 0xbdd   :  { %v1481_v59 = vsub.f32 %v4171_v27, %v1477_v33  ;;  %v1478_v60 = vmul.f32 0.03125, %v1472_v37  ;;  %v1484_v5 = vmul.f32 %v1480_v49, %v1480_v49  ;;  %v4227_v37 = vld [vmem:[%s4708_s3 + $0x10] sm:$0xff] }
 0xbde   :  { %v1475_v3 = vpop.xlane.xlu1 %1474 }
 0xbdf   :  { %v1482_v9 = vsub.f32 %v4169_v19, %v1478_v60  ;;  %v1479_v4 = vmul.f32 0.03125, %v1475_v3  ;;  %v1488_v56 = vsel %vm138_vm1, %v1484_v5, 0.0  ;;  %v1485_v63 = vmul.f32 %v1481_v59, %v1481_v59  ;;  %v4235_v60 = vld [vmem:[%s4708_s3 + $0x30] sm:$0xff] }
 0xbe0   :  { %1489 = vadd.xlane.f32.xlu0 %v1488_v56  ;;  %v4243_v3 = vld [vmem:[%s4708_s3 + $0x50] sm:$0xff] }
 0xbe1   :  { %v1483_v50 = vsub.f32 %v4175_v48, %v1479_v4  ;;  %v1491_v6 = vsel %vm138_vm1, %v1485_v63, 0.0  ;;  %v1486_v44 = vmul.f32 %v1482_v9, %v1482_v9  ;;  %v4251_v63 = vld [vmem:[%s4708_s3 + $0x70] sm:$0xff] }
 0xbe2   :  { %1492 = vadd.xlane.f32.xlu1 %v1491_v6  ;;  %v4259_v6 = vld [vmem:[%s4708_s3] sm:$0xff] }
 0xbe3   :  { %v1494_v58 = vsel %vm138_vm1, %v1486_v44, 0.0  ;;  %v1487_v55 = vmul.f32 %v1483_v50, %v1483_v50 }
 0xbe4   :  { %1495 = vadd.xlane.f32.xlu0 %v1494_v58  ;;  %v4265_v58 = vld [vmem:[%s4708_s3 + $0x20] sm:$0xff] }
 0xbe5   :  { %v1497_v43 = vsel %vm138_vm1, %v1487_v55, 0.0 }
 0xbe6   :  { %1498 = vadd.xlane.f32.xlu1 %v1497_v43  ;;  %v4273_v43 = vld [vmem:[%s4708_s3 + $0x40] sm:$0xff] }
 0xc6d   :  { %v1490_v61 = vpop.xlane.xlu0 %1489 }
 0xc6e   :  { %v1500_v57 = vmul.f32 0.03125, %v1490_v61  ;;  %v4287_v61 = vld [vmem:[%s4708_s3 + $0x38] sm:$0xff] }
 0xc6f   :  { %v1493_v2 = vpop.xlane.xlu1 %1492 }
 0xc70   :  { %v1504_v62 = vadd.f32 1e-05, %v1500_v57  ;;  %v1501_v17 = vmul.f32 0.03125, %v1493_v2  ;;  %v4293_v2 = vld [vmem:[%s4708_s3 + $0x58] sm:$0xff] }
 0xc71   :  { %v1496_v7 = vpop.xlane.xlu0 %1495 }
 0xc72   :  { %3412 = vrsqrt.f32 %v1504_v62  ;;  %v1505_v13 = vadd.f32 1e-05, %v1501_v17  ;;  %v1502_v8 = vmul.f32 0.03125, %v1496_v7  ;;  %v4299_v17 = vld [vmem:[%s4708_s3 + $0x78] sm:$0xff] }
 0xc73   :  { %v1499_v14 = vpop.xlane.xlu1 %1498 }
 0xc74   :  { %3414 = vrsqrt.f32 %v1505_v13  ;;  %v1506_v28 = vadd.f32 1e-05, %v1502_v8  ;;  %v1503_v20 = vmul.f32 0.03125, %v1499_v14  ;;  %v4305_v13 = vld [vmem:[%s4708_s3 + $0x8] sm:$0xff] }
 0xc75   :  { %v4311_v14 = vld [vmem:[%s4708_s3 + $0x28] sm:$0xff] }
 0xc76   :  { %3416 = vrsqrt.f32 %v1506_v28  ;;  %v1507_v25 = vadd.f32 1e-05, %v1503_v20  ;;  %v4317_v20 = vld [vmem:[%s4708_s3 + $0x48] sm:$0xff] }
 0xc78   :  { %3418 = vrsqrt.f32 %v1507_v25 }
 0xc7c   :  { %v3413_v11 = vpop.eup %3412 }
 0xc7d   :  { %v1512_v34 = vmul.f32 %v3413_v11, %v1480_v49  ;;  %v4323_v11 = vld [vmem:[%s4708_s3 + $0x68] sm:$0xff] }
 0xc7e   :  { %v3415_v10 = vpop.eup %3414 }
 0xc7f   :  { %v1513_v35 = vmul.f32 %v3415_v10, %v1481_v59  ;;  %v1522_v18 = vmul.f32 %v2846_v12, %v1512_v34  ;;  %v2861_v10 = vld [vmem:[%s4710_s5 + $0x10] ss:$0 sm:$0xff] }
 0xc80   :  { %v3417_v39 = vpop.eup %3416 }
 0xc81   :  { %v1514_v24 = vmul.f32 %v3417_v39, %v1482_v9  ;;  %v1523_v40 = vmul.f32 %v2846_v12, %v1513_v35  ;;  %v1532_v23 = vadd.f32 %v2847_v16, %v1522_v18  ;;  %v4332_v35 = vld [vmem:[%s4708_s3 + $0x60] sm:$0xff] }
 0xc82   :  { %v3419_v21 = vpop.eup %3418 }
 0xc83   :  { %v1524_v22 = vmul.f32 %v2846_v12, %v1514_v24  ;;  %v1515_v15 = vmul.f32 %v3419_v21, %v1483_v50  ;;  %v1533_v26 = vadd.f32 %v2847_v16, %v1523_v40 }
 0xc85   :  { %v1525_v29 = vmul.f32 %v2846_v12, %v1515_v15  ;;  %v1536_v46 = vpack.c.bf16 %v1533_v26, %v1532_v23  ;;  %v1534_v36 = vadd.f32 %v2847_v16, %v1524_v22 }
 0xc87   :  { %3164 = vmatprep.mubr.msk.bf16.mxu1 %vm138_vm1, %v1536_v46  ;;  %v1535_v30 = vadd.f32 %v2847_v16, %v1525_v29 }
 0xc89   :  { %v1537_v38 = vpack.c.bf16 %v1535_v30, %v1534_v36 }
 0xc8b   :  { %3165 = vmatmul.mubr.msk.bf16.vlgmr.msra.gmra.mrb[28].mxu1 %vm138_vm1, %v1537_v38 }
 0xc8c   :  { %3169 = vmatpush3.bf16.msra.mxu1 %v3292_v54  ;;  %3172 = vmatprep.mubr.msk.bf16.mxu1 %vm138_vm1, %v1536_v46 }
 0xc8d   :  { %3170 = vmatprep.subr.bf16.mxu1 %v3293_v41 }
 0xc90   :  { %3171 = vmatpush3.bf16.msra.mxu1 %v3293_v41 }
 0xc91   :  { %3176 = vmatprep.subr.bf16.mxu1 %v3294_v32 }
 0xc93   :  { %3173 = vmatmul.mubr.msk.bf16.vlgmr.msra.gmra.mrb[32].mxu1 %vm138_vm1, %v1537_v38 }
 0xc94   :  { %3177 = vmatpush3.bf16.msra.mxu1 %v3294_v32  ;;  %3180 = vmatprep.mubr.msk.bf16.mxu1 %vm138_vm1, %v1536_v46 }
 0xc95   :  { %3178 = vmatprep.subr.bf16.mxu1 %v3295_v47 }
 0xc98   :  { %3179 = vmatpush3.bf16.msra.mxu1 %v3295_v47 }
 0xc9b   :  { %3181 = vmatmul.mubr.msk.bf16.vlgmr.msra.gmra.mrb[36].mxu1 %vm138_vm1, %v1537_v38 }
 0xd5e   :  { %v3166_v45 = vpop.f32.mrb[28].mxu1 }
 0xd5f   :  { %v1610_v0 = vadd.f32 %v3166_v45, %v2852_v1  ;;  %v1601_v42 = vpop.f32.mrb[29].mxu1  ;;  %v2870_v45 = vld [vmem:[%s4710_s5 + $0x11] ss:$0 sm:$0xff] }
 0xd60   :  { %v1602_v51 = vadd.f32 %v2852_v1, %v1601_v42  ;;  %v3167_v49 = vpop.f32.mrb[30].mxu1 }
 0xd61   :  { %v1604_v33 = vpop.f32.mrb[31].mxu1  ;;  %v4230_v59 = vmul.f32 %v4227_v37, %v1610_v0  ;;  %v4238_v5 = vmul.f32 %v4235_v60, %v1610_v0  ;;  %v4246_v9 = vmul.f32 %v4243_v3, %v1610_v0  ;;  %v1613_v4 = vadd.f32 %v3167_v49, %v2852_v1 }
 0xd62   :  { %v1605_v56 = vadd.f32 %v2852_v1, %v1604_v33  ;;  %v4254_v50 = vmul.f32 %v4251_v63, %v1610_v0  ;;  %v1760_v44 = vmul.f32 %v4259_v6, %v1602_v51  ;;  %v4268_v55 = vmul.f32 %v4265_v58, %v1602_v51 }
 0xd63   :  { %v4276_v52 = vmul.f32 %v4273_v43, %v1602_v51  ;;  %v1763_v54 = vmul.f32 %v4281_v53, %v1613_v4  ;;  %v1767_v57 = vmul.f32 %v4287_v61, %v1613_v4  ;;  %v1771_v62 = vmul.f32 %v4293_v2, %v1613_v4 }
 0xd64   :  { %v1775_v7 = vmul.f32 %v4299_v17, %v1613_v4  ;;  %v1761_v8 = vmul.f32 %v4305_v13, %v1605_v56  ;;  %v1765_v28 = vmul.f32 %v4311_v14, %v1605_v56  ;;  %v1769_v25 = vmul.f32 %v4317_v20, %v1605_v56 }
 0xd65   :  { %v1773_v12 = vmul.f32 %v4323_v11, %v1605_v56  ;;  %v1772_v18 = vmul.f32 %v4332_v35, %v1602_v51  ;;  %v1777_v39 = vpack.c.bf16 %v1763_v54, %v4230_v59  ;;  %v1779_v24 = vpack.c.bf16 %v1767_v57, %v4238_v5 }
 0xd66   :  { %v3174_v34 = vpop.f32.mrb[32].mxu1  ;;  %v1781_v40 = vpack.c.bf16 %v1771_v62, %v4246_v9  ;;  %v1776_v22 = vpack.c.bf16 %v1761_v8, %v1760_v44  ;;  %v1778_v15 = vpack.c.bf16 %v1765_v28, %v4268_v55  ;;  %v1780_v23 = vpack.c.bf16 %v1769_v25, %v4276_v52  ;;  %v3532_v52 = vld [vmem:[%s4709_s4] sm:$0xff]  ;;  %v3534_v28 = vld [vmem:[%s4709_s4 + $0x8] sm:$0xff] }
 0xd67   :  { %v1673_v16 = vpop.f32.mrb[33].mxu1  ;;  %v1682_v26 = vadd.f32 %v3174_v34, %v2861_v10  ;;  %v1782_v36 = vpack.c.bf16 %v1773_v12, %v1772_v18  ;;  %v1783_v30 = vpack.c.bf16 %v1775_v7, %v4254_v50  ;;  %v3533_v7 = vld [vmem:[%s4709_s4 + $0x10] sm:$0xff]  ;;  %v3535_v34 = vld [vmem:[%s4709_s4 + $0x18] sm:$0xff] }
 0xd68   :  { %v3175_v21 = vpop.f32.mrb[34].mxu1  ;;  %v1674_v38 = vadd.f32 %v2861_v10, %v1673_v16  ;;  %3188 = vmatprep.mubr.msk.bf16.mxu1 %vm138_vm1, %v1776_v22 }
 0xd69   :  { %v1685_v29 = vadd.f32 %v3175_v21, %v2861_v10  ;;  %v1676_v46 = vpop.f32.mrb[35].mxu1 }
 0xd6a   :  { %v1677_v41 = vadd.f32 %v2861_v10, %v1676_v46  ;;  %v3538_v46 = vld [vmem:[%s4709_s4 + $0x28] sm:$0xff] }
 0xd6b   :  { %v1785_v32 = vpack.c.bf16 %v1685_v29, %v1682_v26  ;;  %v3537_v26 = vld [vmem:[%s4709_s4 + $0x30] sm:$0xff] }
 0xd6c   :  { %v1784_v47 = vpack.c.bf16 %v1677_v41, %v1674_v38  ;;  %v3539_v38 = vld [vmem:[%s4709_s4 + $0x38] sm:$0xff] }
 0xd6d   :  { %v1814_v50 = vsel %vm138_vm1, %v1785_v32, 0 }
 0xd6e   :  { %v3182_v1 = vpop.f32.mrb[36].mxu1  ;;  %3262 = vmatprep.subr.msk.bf16.mxu1 %vm138_vm1, %v1784_v47  ;;  %v1811_v0 = vsel %vm138_vm1, %v1784_v47, 0 }
 0xd6f   :  { %v1745_v42 = vpop.f32.mrb[37].mxu1  ;;  %3185 = vmatpush3.bf16.xpose.msra.mxu1 %v1811_v0  ;;  %v1754_v49 = vadd.f32 %v3182_v1, %v2870_v45  ;;  %v3540_v0 = vld [vmem:[%s4709_s4 + $0x40] sm:$0xff] }
 0xd70   :  { %v3183_v51 = vpop.f32.mrb[38].mxu1  ;;  %3263 = vmatprep.subr.msk.bf16.mxu1 %vm138_vm1, %v1785_v32  ;;  %v1746_v5 = vadd.f32 %v2870_v45, %v1745_v42 }
 0xd71   :  { %v1757_v33 = vadd.f32 %v3183_v51, %v2870_v45  ;;  %v1748_v59 = vpop.f32.mrb[39].mxu1 }
 0xd72   :  { %v1749_v9 = vadd.f32 %v2870_v45, %v1748_v59  ;;  %v3541_v59 = vld [vmem:[%s4709_s4 + $0x50] sm:$0xff] }
 0xd73   :  { %v2098_v4 = vpack.c.bf16 %v1757_v33, %v1754_v49 }
 0xd74   :  { %v2097_v56 = vpack.c.bf16 %v1749_v9, %v1746_v5  ;;  %v3542_v9 = vld [vmem:[%s4709_s4 + $0x48] sm:$0xff] }
 0xd76   :  { %3204 = vmatprep.subr.bf16.mxu0 %v2097_v56 }
 0xd77   :  { %3187 = vmatpush3.bf16.xpose.msra.mxu1 %v1814_v50  ;;  %3205 = vmatpush3.bf16.msra.mxu0 %v2097_v56  ;;  %v3543_v50 = vld [vmem:[%s4709_s4 + $0x58] sm:$0xff] }
 0xd78   :  { %3206 = vmatprep.subr.bf16.mxu0 %v2098_v4 }
 0xd7b   :  { %3207 = vmatpush3.bf16.msra.mxu0 %v2098_v4 }
 0xd7e   :  { %3189 = vmatmul.mubr.msk.bf16.vlgmr.msra.gmra.mrb[40].mxu1 %vm138_vm1, %v1777_v39 }
 0xd7f   :  { %3192 = vmatprep.mubr.msk.bf16.mxu1 %vm138_vm1, %v1778_v15 }
 0xd86   :  { %3193 = vmatmul.mubr.msk.bf16.gmra.mrb[44].mxu1 %vm138_vm1, %v1779_v24 }
 0xd87   :  { %3196 = vmatprep.mubr.msk.bf16.mxu1 %vm138_vm1, %v1780_v23 }
 0xd8e   :  { %3197 = vmatmul.mubr.msk.bf16.gmra.mrb[48].mxu1 %vm138_vm1, %v1781_v40  ;;  %v3536_v40 = vld [vmem:[%s4709_s4 + $0x20] sm:$0xff] }
 0xd8f   :  { %3200 = vmatprep.mubr.msk.bf16.mxu1 %vm138_vm1, %v1782_v36 }
 0xd96   :  { %3201 = vmatmul.mubr.msk.bf16.gmra.mrb[52].mxu1 %vm138_vm1, %v1783_v30 }
 0xe51   :  { %v3190_v44 = vpop.f32.mrb[40].mxu1 }
 0xe52   :  { %v1850_v55 = vpop.f32.mrb[41].mxu1  ;;  %v4364_v8 = vadd.f32 %v3533_v7, %v3190_v44  ;;  %v3544_v7 = vld [vmem:[%s4709_s4 + $0x60] sm:$0xff] }
 0xe53   :  { %v4359_v54 = vadd.f32 %v3532_v52, %v1850_v55  ;;  %v3191_v57 = vpop.f32.mrb[42].mxu1 }
 0xe54   :  { %v1853_v62 = vpop.f32.mrb[43].mxu1  ;;  %v4376_v10 = vadd.f32 %v3535_v34, %v3191_v57  ;;  %v1919_v16 = vsel %vm138_vm1, %v4364_v8, -inf }
 0xe55   :  { %v4369_v25 = vadd.f32 %v3534_v28, %v1853_v62  ;;  %v1913_v12 = vsel %vm138_vm1, %v4359_v54, -inf }
 0xe56   :  { %1914 = vmax.xlane.f32.xlu0 %v1913_v12  ;;  %v1922_v15 = vsel %vm138_vm1, %v4376_v10, -inf }
 0xe57   :  { %v1916_v18 = vsel %vm138_vm1, %v4369_v25, -inf }
 0xe58   :  { %1917 = vmax.xlane.f32.xlu1 %v1916_v18 }
 0xe59   :  { %v3194_v39 = vpop.f32.mrb[44].mxu1 }
 0xe5a   :  { %v1866_v24 = vpop.f32.mrb[45].mxu1  ;;  %1920 = vmax.xlane.f32.xlu0 %v1919_v16  ;;  %v4392_v29 = vadd.f32 %v3537_v26, %v3194_v39  ;;  %v3545_v39 = vld [vmem:[%s4709_s4 + $0x70] sm:$0xff] }
 0xe5b   :  { %v4385_v21 = vadd.f32 %v3536_v40, %v1866_v24  ;;  %v3195_v22 = vpop.f32.mrb[46].mxu1  ;;  %v3546_v24 = vld [vmem:[%s4709_s4 + $0x68] sm:$0xff] }
 0xe5c   :  { %v1869_v23 = vpop.f32.mrb[47].mxu1  ;;  %1923 = vmax.xlane.f32.xlu1 %v1922_v15  ;;  %v4404_v41 = vadd.f32 %v3539_v38, %v3195_v22  ;;  %v1931_v1 = vsel %vm138_vm1, %v4392_v29, -inf  ;;  %v3547_v15 = vld [vmem:[%s4709_s4 + $0x78] sm:$0xff] }
 0xe5d   :  { %v4397_v36 = vadd.f32 %v3538_v46, %v1869_v23  ;;  %v1925_v30 = vsel %vm138_vm1, %v4385_v21, -inf }
 0xe5e   :  { %1926 = vmax.xlane.f32.xlu0 %v1925_v30  ;;  %v1934_v49 = vsel %vm138_vm1, %v4404_v41, -inf }
 0xe5f   :  { %v1928_v32 = vsel %vm138_vm1, %v4397_v36, -inf }
 0xe60   :  { %1929 = vmax.xlane.f32.xlu1 %v1928_v32 }
 0xe61   :  { %v3198_v47 = vpop.f32.mrb[48].mxu1 }
 0xe62   :  { %v1882_v45 = vpop.f32.mrb[49].mxu1  ;;  %1932 = vmax.xlane.f32.xlu0 %v1931_v1  ;;  %v4420_v5 = vadd.f32 %v3541_v59, %v3198_v47 }
 0xe63   :  { %v4413_v42 = vadd.f32 %v3540_v0, %v1882_v45  ;;  %v3199_v51 = vpop.f32.mrb[50].mxu1 }
 0xe64   :  { %v1885_v33 = vpop.f32.mrb[51].mxu1  ;;  %1935 = vmax.xlane.f32.xlu1 %v1934_v49  ;;  %v4432_v44 = vadd.f32 %v3543_v50, %v3199_v51  ;;  %v1943_v57 = vsel %vm138_vm1, %v4420_v5, -inf }
 0xe65   :  { %v4425_v4 = vadd.f32 %v3542_v9, %v1885_v33  ;;  %v1937_v56 = vsel %vm138_vm1, %v4413_v42, -inf }
 0xe66   :  { %1938 = vmax.xlane.f32.xlu0 %v1937_v56  ;;  %v1946_v34 = vsel %vm138_vm1, %v4432_v44, -inf }
 0xe67   :  { %v1940_v55 = vsel %vm138_vm1, %v4425_v4, -inf }
 0xe68   :  { %1941 = vmax.xlane.f32.xlu1 %v1940_v55 }
 0xe69   :  { %v3202_v52 = vpop.f32.mrb[52].mxu1 }
 0xe6a   :  { %v1898_v62 = vpop.f32.mrb[53].mxu1  ;;  %1944 = vmax.xlane.f32.xlu0 %v1943_v57  ;;  %v4448_v16 = vadd.f32 %v3545_v39, %v3202_v52 }
 0xe6b   :  { %v4441_v28 = vadd.f32 %v3544_v7, %v1898_v62  ;;  %v3203_v12 = vpop.f32.mrb[54].mxu1 }
 0xe6c   :  { %v1901_v18 = vpop.f32.mrb[55].mxu1  ;;  %1947 = vmax.xlane.f32.xlu1 %v1946_v34  ;;  %v4460_v23 = vadd.f32 %v3547_v15, %v3203_v12  ;;  %v1955_v46 = vsel %vm138_vm1, %v4448_v16, -inf }
 0xe6d   :  { %v4453_v40 = vadd.f32 %v3546_v24, %v1901_v18  ;;  %v1949_v22 = vsel %vm138_vm1, %v4441_v28, -inf }
 0xe6e   :  { %1950 = vmax.xlane.f32.xlu0 %v1949_v22  ;;  %v1958_v30 = vsel %vm138_vm1, %v4460_v23, -inf }
 0xe6f   :  { %v1952_v26 = vsel %vm138_vm1, %v4453_v40, -inf }
 0xe70   :  { %1953 = vmax.xlane.f32.xlu1 %v1952_v26 }
 0xe72   :  { %1956 = vmax.xlane.f32.xlu0 %v1955_v46 }
 0xe74   :  { %1959 = vmax.xlane.f32.xlu1 %v1958_v30 }
 0xee3   :  { %v1915_v38 = vpop.xlane.xlu0 %1914 }
 0xee4   :  { %v1961_v32 = vsub.f32 %v4359_v54, %v1915_v38 }
 0xee5   :  { %v1918_v47 = vpop.xlane.xlu1 %1917 }
 0xee6   :  { %v1977_v1 = vmul.f32 1.442695, %v1961_v32  ;;  %v1962_v45 = vsub.f32 %v4369_v25, %v1918_v47 }
 0xee7   :  { %v1921_v0 = vpop.xlane.xlu0 %1920 }
 0xee8   :  { %3420 = vpow2.f32 %v1977_v1  ;;  %v1979_v51 = vmul.f32 1.442695, %v1962_v45  ;;  %v1963_v49 = vsub.f32 %v4364_v8, %v1921_v0 }
 0xee9   :  { %v1924_v33 = vpop.xlane.xlu1 %1923 }
 0xeea   :  { %3422 = vpow2.f32 %v1979_v51  ;;  %v1981_v59 = vmul.f32 1.442695, %v1963_v49  ;;  %v1964_v9 = vsub.f32 %v4376_v10, %v1924_v33 }
 0xeeb   :  { %v1927_v56 = vpop.xlane.xlu0 %1926 }
 0xeec   :  { %3424 = vpow2.f32 %v1981_v59  ;;  %v1983_v50 = vmul.f32 1.442695, %v1964_v9  ;;  %v1965_v55 = vsub.f32 %v4385_v21, %v1927_v56 }
 0xeed   :  { %v1930_v54 = vpop.xlane.xlu1 %1929 }
 0xeee   :  { %3426 = vpow2.f32 %v1983_v50  ;;  %v1985_v52 = vmul.f32 1.442695, %v1965_v55  ;;  %v1966_v25 = vsub.f32 %v4397_v36, %v1930_v54 }
 0xeef   :  { %v1933_v57 = vpop.xlane.xlu0 %1932 }
 0xef0   :  { %3428 = vpow2.f32 %v1985_v52  ;;  %v1987_v62 = vmul.f32 1.442695, %v1966_v25  ;;  %v1967_v8 = vsub.f32 %v4392_v29, %v1933_v57 }
 0xef1   :  { %v1936_v7 = vpop.xlane.xlu1 %1935 }
 0xef2   :  { %v4475_v12 = vpop.eup %3420  ;;  %3430 = vpow2.f32 %v1987_v62  ;;  %v1989_v10 = vmul.f32 1.442695, %v1967_v8  ;;  %v1968_v34 = vsub.f32 %v4404_v41, %v1936_v7 }
 0xef3   :  { %v1939_v18 = vpop.xlane.xlu0 %1938  ;;  %v2009_v21 = vsel %vm138_vm1, %v4475_v12, 0.0 }
 0xef4   :  { %v4480_v39 = vpop.eup %3422  ;;  %3432 = vpow2.f32 %v1989_v10  ;;  %v1991_v36 = vmul.f32 1.442695, %v1968_v34  ;;  %v1969_v24 = vsub.f32 %v4413_v42, %v1939_v18  ;;  %2010 = vadd.xlane.f32.xlu0 %v2009_v21 }
 0xef5   :  { %v1942_v22 = vpop.xlane.xlu1 %1941  ;;  %v2012_v29 = vsel %vm138_vm1, %v4480_v39, 0.0 }
 0xef6   :  { %v4485_v15 = vpop.eup %3424  ;;  %3434 = vpow2.f32 %v1991_v36  ;;  %v1993_v26 = vmul.f32 1.442695, %v1969_v24  ;;  %v1970_v41 = vsub.f32 %v4425_v4, %v1942_v22  ;;  %2013 = vadd.xlane.f32.xlu1 %v2012_v29 }
 0xef7   :  { %v1945_v46 = vpop.xlane.xlu0 %1944  ;;  %v2015_v30 = vsel %vm138_vm1, %v4485_v15, 0.0 }
 0xef8   :  { %v4490_v38 = vpop.eup %3426  ;;  %3436 = vpow2.f32 %v1993_v26  ;;  %v1995_v42 = vmul.f32 1.442695, %v1970_v41  ;;  %v1971_v32 = vsub.f32 %v4420_v5, %v1945_v46  ;;  %2016 = vadd.xlane.f32.xlu0 %v2015_v30 }
 0xef9   :  { %v1948_v47 = vpop.xlane.xlu1 %1947  ;;  %v2018_v1 = vsel %vm138_vm1, %v4490_v38, 0.0 }
 0xefa   :  { %v4495_v45 = vpop.eup %3428  ;;  %3438 = vpow2.f32 %v1995_v42  ;;  %v1997_v4 = vmul.f32 1.442695, %v1971_v32  ;;  %v1972_v0 = vsub.f32 %v4432_v44, %v1948_v47  ;;  %2019 = vadd.xlane.f32.xlu1 %v2018_v1 }
 0xefb   :  { %v1951_v51 = vpop.xlane.xlu0 %1950  ;;  %v2021_v49 = vsel %vm138_vm1, %v4495_v45, 0.0 }
 0xefc   :  { %v4500_v33 = vpop.eup %3430  ;;  %3440 = vpow2.f32 %v1997_v4  ;;  %v1999_v5 = vmul.f32 1.442695, %v1972_v0  ;;  %v1973_v59 = vsub.f32 %v4441_v28, %v1951_v51  ;;  %2022 = vadd.xlane.f32.xlu0 %v2021_v49 }
 0xefd   :  { %v1954_v9 = vpop.xlane.xlu1 %1953  ;;  %v2024_v56 = vsel %vm138_vm1, %v4500_v33, 0.0 }
 0xefe   :  { %v4505_v50 = vpop.eup %3432  ;;  %3442 = vpow2.f32 %v1999_v5  ;;  %v2001_v44 = vmul.f32 1.442695, %v1973_v59  ;;  %v1974_v55 = vsub.f32 %v4453_v40, %v1954_v9  ;;  %2025 = vadd.xlane.f32.xlu1 %v2024_v56 }
 0xeff   :  { %v1957_v54 = vpop.xlane.xlu0 %1956  ;;  %v2027_v52 = vsel %vm138_vm1, %v4505_v50, 0.0 }
 0xf00   :  { %v4510_v25 = vpop.eup %3434  ;;  %3444 = vpow2.f32 %v2001_v44  ;;  %v2003_v28 = vmul.f32 1.442695, %v1974_v55  ;;  %v1975_v57 = vsub.f32 %v4448_v16, %v1957_v54  ;;  %2028 = vadd.xlane.f32.xlu0 %v2027_v52 }
 0xf01   :  { %v1960_v62 = vpop.xlane.xlu1 %1959  ;;  %v2030_v8 = vsel %vm138_vm1, %v4510_v25, 0.0 }
 0xf02   :  { %v4515_v7 = vpop.eup %3436  ;;  %3446 = vpow2.f32 %v2003_v28  ;;  %v2005_v40 = vmul.f32 1.442695, %v1975_v57  ;;  %v1976_v10 = vsub.f32 %v4460_v23, %v1960_v62  ;;  %2031 = vadd.xlane.f32.xlu1 %v2030_v8 }
 0xf03   :  { %v2033_v34 = vsel %vm138_vm1, %v4515_v7, 0.0 }
 0xf04   :  { %v4520_v18 = vpop.eup %3438  ;;  %3448 = vpow2.f32 %v2005_v40  ;;  %v2007_v21 = vmul.f32 1.442695, %v1976_v10  ;;  %2034 = vadd.xlane.f32.xlu0 %v2033_v34 }
 0xf05   :  { %v2036_v16 = vsel %vm138_vm1, %v4520_v18, 0.0 }
 0xf06   :  { %v4524_v36 = vpop.eup %3440  ;;  %3450 = vpow2.f32 %v2007_v21  ;;  %2037 = vadd.xlane.f32.xlu1 %v2036_v16 }
 0xf07   :  { %v2039_v24 = vsel %vm138_vm1, %v4524_v36, 0.0 }
 0xf08   :  { %v4528_v23 = vpop.eup %3442  ;;  %2040 = vadd.xlane.f32.xlu0 %v2039_v24 }
 0xf09   :  { %v2042_v22 = vsel %vm138_vm1, %v4528_v23, 0.0 }
 0xf0a   :  { %v4532_v29 = vpop.eup %3444  ;;  %2043 = vadd.xlane.f32.xlu1 %v2042_v22 }
 0xf0b   :  { %v2045_v26 = vsel %vm138_vm1, %v4532_v29, 0.0 }
 0xf0c   :  { %v4536_v41 = vpop.eup %3446  ;;  %2046 = vadd.xlane.f32.xlu0 %v2045_v26 }
 0xf0d   :  { %v2048_v46 = vsel %vm138_vm1, %v4536_v41, 0.0 }
 0xf0e   :  { %v4540_v30 = vpop.eup %3448  ;;  %2049 = vadd.xlane.f32.xlu1 %v2048_v46 }
 0xf0f   :  { %v2051_v42 = vsel %vm138_vm1, %v4540_v30, 0.0 }
 0xf10   :  { %v4544_v32 = vpop.eup %3450  ;;  %2052 = vadd.xlane.f32.xlu0 %v2051_v42 }
 0xf11   :  { %v2054_v47 = vsel %vm138_vm1, %v4544_v32, 0.0 }
 0xf12   :  { %2055 = vadd.xlane.f32.xlu1 %v2054_v47 }
 0xf81   :  { %v2011_v1 = vpop.xlane.xlu0 %2010 }
 0xf82   :  { %3452 = vrcp.f32 %v2011_v1 }
 0xf83   :  { %v2014_v4 = vpop.xlane.xlu1 %2013 }
 0xf84   :  { %3454 = vrcp.f32 %v2014_v4 }
 0xf85   :  { %v2017_v0 = vpop.xlane.xlu0 %2016 }
 0xf86   :  { %3456 = vrcp.f32 %v2017_v0 }
 0xf87   :  { %v2020_v51 = vpop.xlane.xlu1 %2019 }
 0xf88   :  { %3458 = vrcp.f32 %v2020_v51 }
 0xf89   :  { %v2023_v49 = vpop.xlane.xlu0 %2022 }
 0xf8a   :  { %3460 = vrcp.f32 %v2023_v49 }
 0xf8b   :  { %v2026_v5 = vpop.xlane.xlu1 %2025 }
 0xf8c   :  { %v3453_v59 = vpop.eup %3452  ;;  %3462 = vrcp.f32 %v2026_v5 }
 0xf8d   :  { %v2029_v9 = vpop.xlane.xlu0 %2028  ;;  %v2073_v55 = vmul.f32 %v3453_v59, %v4475_v12 }
 0xf8e   :  { %v3455_v56 = vpop.eup %3454  ;;  %3464 = vrcp.f32 %v2029_v9 }
 0xf8f   :  { %v2032_v44 = vpop.xlane.xlu1 %2031  ;;  %v2074_v54 = vmul.f32 %v3455_v56, %v4480_v39 }
 0xf90   :  { %v3457_v52 = vpop.eup %3456  ;;  %3466 = vrcp.f32 %v2032_v44 }
 0xf91   :  { %v2035_v28 = vpop.xlane.xlu0 %2034  ;;  %v2089_v57 = vpack.c.bf16 %v2074_v54, %v2073_v55  ;;  %v2075_v8 = vmul.f32 %v3457_v52, %v4485_v15 }
 0xf92   :  { %v3459_v62 = vpop.eup %3458  ;;  %3468 = vrcp.f32 %v2035_v28 }
 0xf93   :  { %v2076_v40 = vmul.f32 %v3459_v62, %v4490_v38  ;;  %v2038_v10 = vpop.xlane.xlu1 %2037  ;;  %3208 = vmatprep.mubr.msk.bf16.mxu0 %vm138_vm1, %v2089_v57 }
 0xf94   :  { %v3461_v34 = vpop.eup %3460  ;;  %3470 = vrcp.f32 %v2038_v10 }
 0xf95   :  { %v2041_v21 = vpop.xlane.xlu0 %2040  ;;  %v2090_v16 = vpack.c.bf16 %v2076_v40, %v2075_v8  ;;  %v2077_v24 = vmul.f32 %v3461_v34, %v4495_v45 }
 0xf96   :  { %v3463_v12 = vpop.eup %3462  ;;  %3472 = vrcp.f32 %v2041_v21 }
 0xf97   :  { %v2044_v39 = vpop.xlane.xlu1 %2043  ;;  %3209 = vmatmul.mubr.msk.bf16.vlgmr.msra.gmra.mrb[32].mxu0 %vm138_vm1, %v2090_v16  ;;  %v2078_v22 = vmul.f32 %v3463_v12, %v4500_v33 }
 0xf98   :  { %v3465_v26 = vpop.eup %3464  ;;  %3474 = vrcp.f32 %v2044_v39 }
 0xf99   :  { %v2047_v15 = vpop.xlane.xlu0 %2046  ;;  %v2091_v38 = vpack.c.bf16 %v2078_v22, %v2077_v24  ;;  %v2079_v47 = vmul.f32 %v3465_v26, %v4505_v50 }
 0xf9a   :  { %v3467_v46 = vpop.eup %3466  ;;  %3476 = vrcp.f32 %v2047_v15 }
 0xf9b   :  { %v2050_v42 = vpop.xlane.xlu1 %2049  ;;  %3212 = vmatprep.mubr.msk.bf16.mxu0 %vm138_vm1, %v2091_v38  ;;  %v2080_v1 = vmul.f32 %v3467_v46, %v4510_v25 }
 0xf9c   :  { %v3469_v4 = vpop.eup %3468  ;;  %3478 = vrcp.f32 %v2050_v42 }
 0xf9d   :  { %v2053_v0 = vpop.xlane.xlu0 %2052  ;;  %v2092_v51 = vpack.c.bf16 %v2080_v1, %v2079_v47  ;;  %v2081_v49 = vmul.f32 %v3469_v4, %v4515_v7 }
 0xf9e   :  { %v3471_v45 = vpop.eup %3470  ;;  %3480 = vrcp.f32 %v2053_v0 }
 0xf9f   :  { %v2056_v33 = vpop.xlane.xlu1 %2055  ;;  %3213 = vmatmul.mubr.msk.bf16.gmra.mrb[36].mxu0 %vm138_vm1, %v2092_v51  ;;  %v2082_v5 = vmul.f32 %v3471_v45, %v4520_v18 }
 0xfa0   :  { %v3473_v59 = vpop.eup %3472  ;;  %3482 = vrcp.f32 %v2056_v33 }
 0xfa1   :  { %v2093_v9 = vpack.c.bf16 %v2082_v5, %v2081_v49  ;;  %v2083_v50 = vmul.f32 %v3473_v59, %v4524_v36 }
 0xfa2   :  { %v3475_v56 = vpop.eup %3474 }
 0xfa3   :  { %3216 = vmatprep.mubr.msk.bf16.mxu0 %vm138_vm1, %v2093_v9  ;;  %v2084_v25 = vmul.f32 %v3475_v56, %v4528_v23  ;;  %v3296_v23 = vld [vmem:[%s4712_s7 + $0x70] sm:$0xff]  }
 0xfa4   :  { %v3477_v44 = vpop.eup %3476  ;;  %3224 = vmatprep.subr.bf16.mxu0 %v3296_v23 }
 0xfa5   :  { %v2094_v55 = vpack.c.bf16 %v2084_v25, %v2083_v50  ;;  %v2085_v52 = vmul.f32 %v3477_v44, %v4532_v29  ;;  %3225 = vmatpush3.bf16.msra.mxu0 %v3296_v23  ;;  %v3297_v29 = vld [vmem:[%s4712_s7 + $0x78] sm:$0xff]  }
 0xfa6   :  { %v3479_v54 = vpop.eup %3478  ;;  %3226 = vmatprep.subr.bf16.mxu0 %v3297_v29 }
 0xfa7   :  { %3217 = vmatmul.mubr.msk.bf16.gmra.mrb[40].mxu0 %vm138_vm1, %v2094_v55  ;;  %v2086_v7 = vmul.f32 %v3479_v54, %v4536_v41 }
 0xfa8   :  { %v3481_v18 = vpop.eup %3480 }
 0xfa9   :  { %v2095_v28 = vpack.c.bf16 %v2086_v7, %v2085_v52  ;;  %v2087_v62 = vmul.f32 %v3481_v18, %v4540_v30  ;;  %3227 = vmatpush3.bf16.msra.mxu0 %v3297_v29 }
 0xfaa   :  { %v3483_v57 = vpop.eup %3482 }
 0xfab   :  { %3220 = vmatprep.mubr.msk.bf16.mxu0 %vm138_vm1, %v2095_v28  ;;  %v2088_v36 = vmul.f32 %v3483_v57, %v4544_v32 }
 0xfad   :  { %v2096_v8 = vpack.c.bf16 %v2088_v36, %v2087_v62 }
 0xfaf   :  { %3221 = vmatmul.mubr.msk.bf16.gmra.mrb[44].mxu0 %vm138_vm1, %v2096_v8 }
0x106a   :  { %v3210_v41 = vpop.f32.mrb[32].mxu0 }
0x106b   :  { %v2157_v40 = vpop.f32.mrb[33].mxu0  ;;  %v2222_v34 = vmul.f32 %v4227_v37, %v3210_v41 }
0x106c   :  { %v3211_v30 = vpop.f32.mrb[34].mxu0  ;;  %v2220_v12 = vmul.f32 %v4259_v6, %v2157_v40 }
0x106d   :  { %v2160_v10 = vpop.f32.mrb[35].mxu0  ;;  %v2223_v22 = vmul.f32 %v4281_v53, %v3211_v30 }
0x106e   :  { %v2221_v46 = vmul.f32 %v4305_v13, %v2160_v10 }
0x1072   :  { %v3214_v32 = vpop.f32.mrb[36].mxu0 }
0x1073   :  { %v2226_v21 = vmul.f32 %v4235_v60, %v3214_v32  ;;  %v2173_v16 = vpop.f32.mrb[37].mxu0 }
0x1074   :  { %v2224_v39 = vmul.f32 %v4265_v58, %v2173_v16  ;;  %v3215_v24 = vpop.f32.mrb[38].mxu0 }
0x1075   :  { %v2238_v26 = vadd.f32 %v2226_v21, %v2222_v34  ;;  %v2227_v15 = vmul.f32 %v4287_v61, %v3215_v24  ;;  %v2176_v38 = vpop.f32.mrb[39].mxu0 }
0x1076   :  { %v2236_v42 = vadd.f32 %v2224_v39, %v2220_v12  ;;  %v2225_v47 = vmul.f32 %v4311_v14, %v2176_v38 }
0x1077   :  { %v2239_v37 = vadd.f32 %v2227_v15, %v2223_v22 }
0x1078   :  { %v2237_v1 = vadd.f32 %v2225_v47, %v2221_v46 }
0x107a   :  { %v3218_v60 = vpop.f32.mrb[40].mxu0 }
0x107b   :  { %v2230_v4 = vmul.f32 %v4243_v3, %v3218_v60  ;;  %v2189_v6 = vpop.f32.mrb[41].mxu0  ;;  %v3299_v60 = vld [vmem:[%s4713_s8 + $0x18] sm:$0xff]  }
0x107c   :  { %v2228_v58 = vmul.f32 %v4273_v43, %v2189_v6  ;;  %v3219_v0 = vpop.f32.mrb[42].mxu0 }
0x107d   :  { %v2242_v51 = vadd.f32 %v2238_v26, %v2230_v4  ;;  %v2231_v53 = vmul.f32 %v4293_v2, %v3219_v0  ;;  %v2192_v45 = vpop.f32.mrb[43].mxu0 }
0x107e   :  { %v2240_v61 = vadd.f32 %v2236_v42, %v2228_v58  ;;  %v2229_v33 = vmul.f32 %v4317_v20, %v2192_v45 }
0x107f   :  { %v2243_v13 = vadd.f32 %v2239_v37, %v2231_v53 }
0x1080   :  { %v2241_v49 = vadd.f32 %v2237_v1, %v2229_v33 }
0x1082   :  { %v3222_v5 = vpop.f32.mrb[44].mxu0 }
0x1083   :  { %v2234_v14 = vmul.f32 %v4251_v63, %v3222_v5  ;;  %v2205_v59 = vpop.f32.mrb[45].mxu0 }
0x1084   :  { %v2232_v9 = vmul.f32 %v4332_v35, %v2205_v59  ;;  %v3223_v3 = vpop.f32.mrb[46].mxu0  ;;  %v2899_v35 = vld [vmem:[%s4710_s5 + $0x12] ss:$0 sm:$0xff]  ;;  %v2900_v59 = vld [vmem:[%s4710_s5 + $0x13] ss:$0 sm:$0xff] }
0x1085   :  { %v2246_v56 = vadd.f32 %v2242_v51, %v2234_v14  ;;  %v2235_v43 = vmul.f32 %v4299_v17, %v3223_v3  ;;  %v2208_v50 = vpop.f32.mrb[47].mxu0 }
0x1086   :  { %v2244_v25 = vadd.f32 %v2240_v61, %v2232_v9  ;;  %v2233_v2 = vmul.f32 %v4323_v11, %v2208_v50 }
0x1087   :  { %v2247_v44 = vadd.f32 %v2243_v13, %v2235_v43 }
0x1088   :  { %v2245_v55 = vadd.f32 %v2241_v49, %v2233_v2 }
0x1089   :  { %v2249_v54 = vpack.c.bf16 %v2247_v44, %v2246_v56 }
0x108a   :  { %v2248_v20 = vpack.c.bf16 %v2245_v55, %v2244_v25  ;;  %v2901_v25 = vld [vmem:[%s4710_s5 + $0x14] ss:$0 sm:$0xff] }
0x108c   :  { %3228 = vmatprep.mubr.msk.bf16.mxu0 %vm138_vm1, %v2248_v20 }
0x108d   :  { %3229 = vmatmul.mubr.msk.bf16.vlgmr.msra.gmra.mrb[48].mxu0 %vm138_vm1, %v2249_v54 }
0x1160   :  { %v3230_v63 = vpop.f32.mrb[48].mxu0 }
0x1161   :  { %v2307_v52 = vpop.f32.mrb[49].mxu0  ;;  %v2324_v17 = vadd.f32 %v3230_v63, %v4169_v19 }
0x1162   :  { %v2322_v7 = vadd.f32 %v2307_v52, %v4165_v31  ;;  %v3231_v18 = vpop.f32.mrb[50].mxu0 }
0x1163   :  { %v2310_v11 = vpop.f32.mrb[51].mxu0  ;;  %v2325_v57 = vadd.f32 %v3231_v18, %v4175_v48  ;;  %v4605_v36 = vadd.f32 %v2899_v35, %v2324_v17  ;;  %v3298_v48 = vld [vmem:[%s4713_s8 + $0x10] sm:$0xff]   ;;  %s2737_s8 = sshll.u32 %s3572_s16, 4  ;;  %s2738_s8 = int_to_ptr.vmem [resolvable:$true] %s2737_s8 }
0x1164   :  { %v4601_v28 = vadd.f32 %v2899_v35, %v2322_v7  ;;  %v2323_v62 = vadd.f32 %v2310_v11, %v4171_v27  ;;  %3232 = vmatprep.subr.bf16.mxu1 %v3298_v48  ;;  %p3553_p1 = scmp.lt.s32.totalorder %s2738_s8, %s2738_s8 }
0x1165   :  { %v4611_v29 = vadd.f32 %v2899_v35, %v2325_v57  ;;  %v2342_v19 = vsel %vm138_vm1, %v4605_v36, 0.0  ;;  %3233 = vmatpush3.bf16.msra.mxu1 %v3298_v48  ;;  %v3300_v57 = vld [vmem:[%s4714_s9 + $0x40] sm:$0xff]   ;;  %v3306_v48 = vld [vmem:[%s4714_s9 + $0x70] sm:$0xff]  }
0x1166   :  { %v4607_v8 = vadd.f32 %v2899_v35, %v2323_v62  ;;  %v2336_v23 = vsel %vm138_vm1, %v4601_v28, 0.0  ;;  %3234 = vmatprep.subr.bf16.mxu1 %v3299_v60  ;;  %3240 = vmatprep.subr.bf16.mxu0 %v3300_v57  ;;  %v3301_v62 = vld [vmem:[%s4714_s9 + $0x48] sm:$0xff]  }
0x1167   :  { %2337 = vadd.xlane.f32.xlu0 %v2336_v23  ;;  %v2345_v27 = vsel %vm138_vm1, %v4611_v29, 0.0  ;;  %3241 = vmatpush3.bf16.msra.mxu0 %v3300_v57  ;;  %v3302_v23 = vld [vmem:[%s4714_s9 + $0x50] sm:$0xff]  }
0x1168   :  { %v2339_v31 = vsel %vm138_vm1, %v4607_v8, 0.0  ;;  %3242 = vmatprep.subr.bf16.mxu0 %v3301_v62 }
0x1169   :  { %2340 = vadd.xlane.f32.xlu1 %v2339_v31  ;;  %3235 = vmatpush3.bf16.msra.mxu1 %v3299_v60  ;;  %v3303_v31 = vld [vmem:[%s4714_s9 + $0x58] sm:$0xff]  }
0x116b   :  { %2343 = vadd.xlane.f32.xlu0 %v2342_v19  ;;  %3243 = vmatpush3.bf16.msra.mxu0 %v3301_v62  ;;  %v3304_v19 = vld [vmem:[%s4714_s9 + $0x60] sm:$0xff]  }
0x116c   :  { %3244 = vmatprep.subr.bf16.mxu0 %v3302_v23 }
0x116d   :  { %2346 = vadd.xlane.f32.xlu1 %v2345_v27  ;;  %v3305_v27 = vld [vmem:[%s4714_s9 + $0x68] sm:$0xff]  }
0x116f   :  { %3245 = vmatpush3.bf16.msra.mxu0 %v3302_v23 }
0x1170   :  { %3246 = vmatprep.subr.bf16.mxu0 %v3303_v31 }
0x1173   :  { %3247 = vmatpush3.bf16.msra.mxu0 %v3303_v31 }
0x1174   :  { %3248 = vmatprep.subr.bf16.mxu0 %v3304_v19 }
0x1177   :  { %3249 = vmatpush3.bf16.msra.mxu0 %v3304_v19 }
0x1178   :  { %3250 = vmatprep.subr.bf16.mxu0 %v3305_v27 }
0x117b   :  { %3251 = vmatpush3.bf16.msra.mxu0 %v3305_v27 }
0x117c   :  { %3252 = vmatprep.subr.bf16.mxu0 %v3306_v48 }
0x117f   :  { %3253 = vmatpush3.bf16.msra.mxu0 %v3306_v48 }
0x11f4   :  { %v2338_v41 = vpop.xlane.xlu0 %2337 }
0x11f5   :  { %v2348_v40 = vmul.f32 0.03125, %v2338_v41  ;;  %v3307_v41 = vld [vmem:[%s4714_s9 + $0x78] sm:$0xff]  }
0x11f6   :  { %v2341_v30 = vpop.xlane.xlu1 %2340  ;;  %3254 = vmatprep.subr.bf16.mxu0 %v3307_v41 }
0x11f7   :  { %v2352_v10 = vsub.f32 %v4601_v28, %v2348_v40  ;;  %v2349_v32 = vmul.f32 0.03125, %v2341_v30  ;;  %3255 = vmatpush3.bf16.msra.mxu0 %v3307_v41  ;;  %v2907_v40 = vld [vmem:[%s4711_s6 + $0x1] ss:$0 sm:$0xff] }
0x11f8   :  { %v2344_v34 = vpop.xlane.xlu0 %2343 }
0x11f9   :  { %v2353_v21 = vsub.f32 %v4607_v8, %v2349_v32  ;;  %v2350_v16 = vmul.f32 0.03125, %v2344_v34  ;;  %v2356_v12 = vmul.f32 %v2352_v10, %v2352_v10 }
0x11fa   :  { %v2347_v39 = vpop.xlane.xlu1 %2346 }
0x11fb   :  { %v2354_v24 = vsub.f32 %v4605_v36, %v2350_v16  ;;  %v2351_v22 = vmul.f32 0.03125, %v2347_v39  ;;  %v2360_v26 = vsel %vm138_vm1, %v2356_v12, 0.0  ;;  %v2357_v15 = vmul.f32 %v2353_v21, %v2353_v21 }
0x11fc   :  { %2361 = vadd.xlane.f32.xlu0 %v2360_v26 }
0x11fd   :  { %v2355_v38 = vsub.f32 %v4611_v29, %v2351_v22  ;;  %v2363_v46 = vsel %vm138_vm1, %v2357_v15, 0.0  ;;  %v2358_v42 = vmul.f32 %v2354_v24, %v2354_v24 }
0x11fe   :  { %2364 = vadd.xlane.f32.xlu1 %v2363_v46 }
0x11ff   :  { %v2366_v47 = vsel %vm138_vm1, %v2358_v42, 0.0  ;;  %v2359_v37 = vmul.f32 %v2355_v38, %v2355_v38 }
0x1200   :  { %2367 = vadd.xlane.f32.xlu0 %v2366_v47 }
0x1201   :  { %v2369_v1 = vsel %vm138_vm1, %v2359_v37, 0.0 }
0x1202   :  { %2370 = vadd.xlane.f32.xlu1 %v2369_v1 }
0x1289   :  { %v2362_v4 = vpop.xlane.xlu0 %2361 }
0x128a   :  { %v2372_v6 = vmul.f32 0.03125, %v2362_v4 }
0x128b   :  { %v2365_v58 = vpop.xlane.xlu1 %2364 }
0x128c   :  { %v2376_v0 = vadd.f32 1e-05, %v2372_v6  ;;  %v2373_v51 = vmul.f32 0.03125, %v2365_v58 }
0x128d   :  { %v2368_v53 = vpop.xlane.xlu0 %2367 }
0x128e   :  { %3484 = vrsqrt.f32 %v2376_v0  ;;  %v2377_v45 = vadd.f32 1e-05, %v2373_v51  ;;  %v2374_v61 = vmul.f32 0.03125, %v2368_v53 }
0x128f   :  { %v2371_v33 = vpop.xlane.xlu1 %2370 }
0x1290   :  { %3486 = vrsqrt.f32 %v2377_v45  ;;  %v2378_v13 = vadd.f32 1e-05, %v2374_v61  ;;  %v2375_v49 = vmul.f32 0.03125, %v2371_v33 }
0x1292   :  { %3488 = vrsqrt.f32 %v2378_v13  ;;  %v2379_v5 = vadd.f32 1e-05, %v2375_v49 }
0x1294   :  { %3490 = vrsqrt.f32 %v2379_v5 }
0x1298   :  { %v3485_v14 = vpop.eup %3484 }
0x1299   :  { %v2384_v9 = vmul.f32 %v3485_v14, %v2352_v10 }
0x129a   :  { %v3487_v3 = vpop.eup %3486 }
0x129b   :  { %v2385_v56 = vmul.f32 %v3487_v3, %v2353_v21  ;;  %v2394_v43 = vmul.f32 %v2900_v59, %v2384_v9 }
0x129c   :  { %v3489_v50 = vpop.eup %3488 }
0x129d   :  { %v2386_v2 = vmul.f32 %v3489_v50, %v2354_v24  ;;  %v2395_v44 = vmul.f32 %v2900_v59, %v2385_v56  ;;  %v2404_v63 = vadd.f32 %v2901_v25, %v2394_v43  ;;  %v2940_v56 = vld [vmem:[%s4710_s5 + $0x15] ss:$0 sm:$0xff] }
0x129e   :  { %v3491_v55 = vpop.eup %3490 }
0x129f   :  { %v2396_v54 = vmul.f32 %v2900_v59, %v2386_v2  ;;  %v2387_v20 = vmul.f32 %v3491_v55, %v2355_v38  ;;  %v2405_v35 = vadd.f32 %v2901_v25, %v2395_v44 }
0x12a1   :  { %v2397_v52 = vmul.f32 %v2900_v59, %v2387_v20  ;;  %v2408_v17 = vpack.c.bf16 %v2405_v35, %v2404_v63  ;;  %v2406_v7 = vadd.f32 %v2901_v25, %v2396_v54 }
0x12a3   :  { %v2407_v18 = vadd.f32 %v2901_v25, %v2397_v52  ;;  %3236 = vmatprep.mubr.msk.bf16.mxu1 %vm138_vm1, %v2408_v17 }
0x12a5   :  { %v2409_v11 = vpack.c.bf16 %v2407_v18, %v2406_v7 }
0x12a7   :  { %3237 = vmatmul.mubr.msk.bf16.vlgmr.msra.gmra.mrb[56].mxu1 %vm138_vm1, %v2409_v11 }
0x137a   :  { %v3238_v30 = vpop.f32.mrb[56].mxu1 }
0x137b   :  { %v2484_v10 = vadd.f32 %v3238_v30, %v2907_v40  ;;  %v2475_v32 = vpop.f32.mrb[57].mxu1 }
0x137c   :  { %v2476_v34 = vadd.f32 %v2907_v40, %v2475_v32  ;;  %v3239_v21 = vpop.f32.mrb[58].mxu1 }
0x137d   :  { %v2914_v16 = vmul.f32 -1.702, %v2484_v10  ;;  %v2487_v12 = vadd.f32 %v3239_v21, %v2907_v40  ;;  %v2478_v39 = vpop.f32.mrb[59].mxu1 }
0x137e   :  { %v2912_v24 = vmul.f32 -1.702, %v2476_v34  ;;  %v2479_v22 = vadd.f32 %v2907_v40, %v2478_v39 }
0x137f   :  { %v2502_v26 = vmul.f32 1.442695, %v2914_v16  ;;  %v2915_v15 = vmul.f32 -1.702, %v2487_v12 }
0x1380   :  { %v2498_v38 = vmul.f32 1.442695, %v2912_v24  ;;  %v2913_v46 = vmul.f32 -1.702, %v2479_v22 }
0x1381   :  { %3492 = vpow2.f32 %v2502_v26  ;;  %v2504_v42 = vmul.f32 1.442695, %v2915_v15 }
0x1382   :  { %3494 = vpow2.f32 %v2498_v38  ;;  %v2500_v47 = vmul.f32 1.442695, %v2913_v46 }
0x1383   :  { %3496 = vpow2.f32 %v2504_v42 }
0x1384   :  { %3498 = vpow2.f32 %v2500_v47 }
0x138b   :  { %v3493_v37 = vpop.eup %3492 }
0x138c   :  { %v3495_v1 = vpop.eup %3494  ;;  %v2508_v60 = vadd.f32 1.0, %v3493_v37 }
0x138d   :  { %v3497_v4 = vpop.eup %3496  ;;  %v2506_v6 = vadd.f32 1.0, %v3495_v1 }
0x138e   :  { %v3499_v58 = vpop.eup %3498  ;;  %3500 = vrcp.f32 %v2508_v60  ;;  %v2509_v0 = vadd.f32 1.0, %v3497_v4 }
0x138f   :  { %3502 = vrcp.f32 %v2506_v6  ;;  %v2507_v51 = vadd.f32 1.0, %v3499_v58  ;;  %v2943_v6 = vld [vmem:[%s4710_s5 + $0x2] ss:$0 sm:$0xff] }
0x1390   :  { %3504 = vrcp.f32 %v2509_v0 }
0x1391   :  { %3506 = vrcp.f32 %v2507_v51  ;;  %v2944_v51 = vld [vmem:[%s4710_s5 + $0x3] ss:$0 sm:$0xff]  ;;  %s3548_s5 = scalar_lea.vmem %s2738_s8, 512 }
0x1392   :  { %p3549_p0 = scmp.ne.s32.totalorder %s2738_s8, %s3548_s5  ;;  %p3554_p2 = scmp.lt.s32.totalorder %s3548_s5, %s3548_s5 }
0x1394   :  { %p3555_p3 = por %p3554_p2, %p3553_p1 }
0x1396   :  { %p3556_p4 = pnand %p3555_p3, %p3549_p0 }
0x1398   :  { %v3501_v53 = vpop.eup %3500 }
0x1399   :  { %v3503_v45 = vpop.eup %3502  ;;  %v2520_v13 = vmul.f32 %v3501_v53, %v2484_v10 }
0x139a   :  { %v3505_v61 = vpop.eup %3504  ;;  %v2518_v5 = vmul.f32 %v3503_v45, %v2476_v34 }
0x139b   :  { %v3507_v33 = vpop.eup %3506  ;;  %v2521_v49 = vmul.f32 %v3505_v61, %v2487_v12 }
0x139c   :  { %v2519_v14 = vmul.f32 %v3507_v33, %v2479_v22 }
0x139d   :  { %v2523_v59 = vpack.c.bf16 %v2521_v49, %v2520_v13 }
0x139e   :  { %v2522_v9 = vpack.c.bf16 %v2519_v14, %v2518_v5 }
0x13a0   :  { %3256 = vmatprep.mubr.bf16.mxu0 %v2522_v9 }
0x13a1   :  { %3257 = vmatmul.mubr.bf16.vlgmr.msra.gmra.mrb[52].mxu0 %v2523_v59 }
0x1474   :  { %v3258_v3 = vpop.f32.mrb[52].mxu0 }
0x1475   :  { %v2623_v43 = vpop.f32.mrb[53].mxu0  ;;  %v2640_v50 = vadd.f32 %v3258_v3, %v4605_v36 }
0x1476   :  { %v2638_v25 = vadd.f32 %v2623_v43, %v4601_v28  ;;  %v3259_v2 = vpop.f32.mrb[54].mxu0 }
0x1477   :  { %v2626_v44 = vpop.f32.mrb[55].mxu0  ;;  %v2641_v54 = vadd.f32 %v3259_v2, %v4611_v29  ;;  %v2650_v63 = vadd.f32 %v2940_v56, %v2640_v50 }
0x1478   :  { %v2648_v55 = vadd.f32 %v2940_v56, %v2638_v25  ;;  %v2639_v20 = vadd.f32 %v2626_v44, %v4607_v8 }
0x1479   :  { %v2651_v17 = vadd.f32 %v2940_v56, %v2641_v54  ;;  %v2662_v36 = vsel %vm138_vm1, %v2650_v63, 0.0 }
0x147a   :  { %v2649_v35 = vadd.f32 %v2940_v56, %v2639_v20  ;;  %v2656_v52 = vsel %vm138_vm1, %v2648_v55, 0.0 }
0x147b   :  { %2657 = vadd.xlane.f32.xlu0 %v2656_v52  ;;  %v2665_v28 = vsel %vm138_vm1, %v2651_v17, 0.0 }
0x147c   :  { %v2659_v7 = vsel %vm138_vm1, %v2649_v35, 0.0 }
0x147d   :  { %2660 = vadd.xlane.f32.xlu1 %v2659_v7 }
0x147f   :  { %2663 = vadd.xlane.f32.xlu0 %v2662_v36 }
0x1481   :  { %2666 = vadd.xlane.f32.xlu1 %v2665_v28 }
0x1508   :  { %v2658_v18 = vpop.xlane.xlu0 %2657 }
0x1509   :  { %v2668_v11 = vmul.f32 0.03125, %v2658_v18 }
0x150a   :  { %v2661_v29 = vpop.xlane.xlu1 %2660 }
0x150b   :  { %v2672_v57 = vsub.f32 %v2648_v55, %v2668_v11  ;;  %v2669_v8 = vmul.f32 0.03125, %v2661_v29 }
0x150c   :  { %v2664_v62 = vpop.xlane.xlu0 %2663 }
0x150d   :  { %v2673_v23 = vsub.f32 %v2649_v35, %v2669_v8  ;;  %v2670_v31 = vmul.f32 0.03125, %v2664_v62  ;;  %v2676_v19 = vmul.f32 %v2672_v57, %v2672_v57 }
0x150e   :  { %v2667_v27 = vpop.xlane.xlu1 %2666 }
0x150f   :  { %v2674_v48 = vsub.f32 %v2650_v63, %v2670_v31  ;;  %v2671_v41 = vmul.f32 0.03125, %v2667_v27  ;;  %v2680_v40 = vsel %vm138_vm1, %v2676_v19, 0.0  ;;  %v2677_v30 = vmul.f32 %v2673_v23, %v2673_v23 }
0x1510   :  { %2681 = vadd.xlane.f32.xlu0 %v2680_v40 }
0x1511   :  { %v2675_v10 = vsub.f32 %v2651_v17, %v2671_v41  ;;  %v2683_v32 = vsel %vm138_vm1, %v2677_v30, 0.0  ;;  %v2678_v34 = vmul.f32 %v2674_v48, %v2674_v48 }
0x1512   :  { %2684 = vadd.xlane.f32.xlu1 %v2683_v32 }
0x1513   :  { %v2686_v21 = vsel %vm138_vm1, %v2678_v34, 0.0  ;;  %v2679_v16 = vmul.f32 %v2675_v10, %v2675_v10 }
0x1514   :  { %2687 = vadd.xlane.f32.xlu0 %v2686_v21 }
0x1515   :  { %v2689_v12 = vsel %vm138_vm1, %v2679_v16, 0.0 }
0x1516   :  { %2690 = vadd.xlane.f32.xlu1 %v2689_v12 }
0x159d   :  { %v2682_v39 = vpop.xlane.xlu0 %2681 }
0x159e   :  { %v2692_v24 = vmul.f32 0.03125, %v2682_v39 }
0x159f   :  { %v2685_v22 = vpop.xlane.xlu1 %2684 }
0x15a0   :  { %v2696_v26 = vadd.f32 1e-05, %v2692_v24  ;;  %v2693_v15 = vmul.f32 0.03125, %v2685_v22 }
0x15a1   :  { %v2688_v38 = vpop.xlane.xlu0 %2687 }
0x15a2   :  { %3508 = vrsqrt.f32 %v2696_v26  ;;  %v2697_v46 = vadd.f32 1e-05, %v2693_v15  ;;  %v2694_v42 = vmul.f32 0.03125, %v2688_v38 }
0x15a3   :  { %v2691_v47 = vpop.xlane.xlu1 %2690 }
0x15a4   :  { %3510 = vrsqrt.f32 %v2697_v46  ;;  %v2698_v37 = vadd.f32 1e-05, %v2694_v42  ;;  %v2695_v1 = vmul.f32 0.03125, %v2691_v47 }
0x15a6   :  { %3512 = vrsqrt.f32 %v2698_v37  ;;  %v2699_v60 = vadd.f32 1e-05, %v2695_v1 }
0x15a8   :  { %3514 = vrsqrt.f32 %v2699_v60 }
0x15ac   :  { %v3509_v4 = vpop.eup %3508 }
0x15ad   :  { %v2704_v58 = vmul.f32 %v3509_v4, %v2672_v57 }
0x15ae   :  { %v3511_v0 = vpop.eup %3510 }
0x15af   :  { %v2714_v53 = vmul.f32 %v2943_v6, %v2704_v58  ;;  %v2705_v45 = vmul.f32 %v3511_v0, %v2673_v23 }
0x15b0   :  { %v3513_v61 = vpop.eup %3512 }
0x15b1   :  { %v2724_v33 = vadd.f32 %v2944_v51, %v2714_v53  ;;  %v2715_v13 = vmul.f32 %v2943_v6, %v2705_v45  ;;  %v2706_v49 = vmul.f32 %v3513_v61, %v2674_v48 }
0x15b2   :  { %v3515_v5 = vpop.eup %3514 }
0x15b3   :  { %2728 = vst.msk [vmem:[#allocation2] sm:$0xff] %vm138_vm1, %v2724_v33  ;;  %v2725_v14 = vadd.f32 %v2944_v51, %v2715_v13  ;;  %v2716_v59 = vmul.f32 %v2943_v6, %v2706_v49  ;;  %v2707_v9 = vmul.f32 %v3515_v5, %v2675_v10 }
0x15b5   :  { %2729 = vst.msk [vmem:[#allocation2 + $0x8] sm:$0xff] %vm138_vm1, %v2725_v14  ;;  %v2726_v3 = vadd.f32 %v2944_v51, %v2716_v59  ;;  %v2717_v56 = vmul.f32 %v2943_v6, %v2707_v9 }
0x15b7   :  { %2730 = vst.msk [vmem:[#allocation2 + $0x10] sm:$0xff] %vm138_vm1, %v2726_v3  ;;  %v2727_v43 = vadd.f32 %v2944_v51, %v2717_v56 }
0x15b9   :  { %2731 = vst.msk [vmem:[#allocation2 + $0x18] sm:$0xff] %vm138_vm1, %v2727_v43 }
0x15ba   :  { %3559 = shalt.err (!%p3556_p4)
}
0x15bb   :  { %s3560_s19 = scalar_lea.hbm %s4715_s10, 512 }
0x15bc   :  { %p3561_p5 = scmp.ne.s32.totalorder %s4715_s10, %s3560_s19  ;;  %p3564_p6 = scmp.lt.u32.totalorder %s3560_s19, %s4715_s10 }
0x15be   :  { %p3566_p7 = pnand %p3564_p6, %p3561_p5 }
0x15c0   :  { %3569 = shalt.err (!%p3566_p7)
}
0x15c1   :  { %s3573_s23 = smov 128   ;;  %s3574_s24 = smov 8  }
0x15c2   :  { %2743 = dma.vmem_to_hbm [thread:$0]  %s2738_s8, 512, %s4715_s10, [#allocation3], %s3573_s23, %s3573_s23, %s3574_s24  }
0x15c3   :  { %3570 = dma.done.wait [#allocation3], 512  }
0x15c4   :  { %3571 = vsyncadd [#allocation3], 4294966784 }
0x15c5   :  { %2747 = vsyncpa [#allocation3], 1 }

</bundles_post_ra>
